<compile_context>
chip_gen: v5e
topology: v5e:2x2
jax: 0.10.0
libtpu: 0.0.40
codegen_flags: <defaults>
</compile_context>

<pallas_src>
import jax
import jax.numpy as jnp
from jax.experimental import pallas as pl
from jax.experimental.pallas import tpu as pltpu


def _make_head_kernel(B, S, H, T, tb):
    """Builds the fused gather + dense + tanh + classifier kernel."""

    def head_kernel(pos_ref, hid_ref, w1_ref, b1_ref, w2_ref, b2_ref,
                    out_ref, ctx_ref, sem_ref):
        # pos_ref : SMEM (B, T) int32     -- scalar-prefetched gather positions
        # hid_ref : HBM  (B, S, H)        -- backbone hidden states (pl.ANY)
        # w1_ref  : VMEM (T*H, H)         -- ContextConcat.dense weight (in, out)
        # b1_ref  : VMEM (1, H)
        # w2_ref  : VMEM (H, L_pad)       -- classifier weight, lane-padded
        # b2_ref  : VMEM (1, L_pad)
        # out_ref : VMEM (tb, L_pad) f32  -- padded logits for this batch tile
        # ctx_ref : VMEM (tb, T*H)        -- gathered + concatenated context
        # sem_ref : DMA sems (tb, T)
        i = pl.program_id(0)

        # ---- hoist all SMEM scalar reads before issuing / waiting DMAs ------
        gathers = []
        for bb in range(tb):
            b = jnp.minimum(i * tb + bb, B - 1)   # clamp batch-padding rows
            for t in range(T):
                gathers.append((bb, t, b, pos_ref[b, t]))

        # ---- gather: T rows per batch element, HBM -> (tb, T*H) VMEM slab ---
        copies = []
        for bb, t, b, p in gathers:
            cp = pltpu.make_async_copy(
                hid_ref.at[b, pl.ds(p, 1), :],                # (1, H) in HBM
                ctx_ref.at[pl.ds(bb, 1), pl.ds(t * H, H)],    # (1, H) slot
                sem_ref.at[bb, t])
            cp.start()
            copies.append(cp)
        for cp in copies:
            cp.wait()

        # ---- fused pooler + classifier: 2 MXU matmuls, f32 accumulation -----
        ctx = ctx_ref[...].astype(w1_ref.dtype)               # (tb, T*H)
        pooled = jnp.dot(ctx, w1_ref[...],
                         preferred_element_type=jnp.float32)  # (tb, H)
        pooled = jnp.tanh(pooled + b1_ref[...].astype(jnp.float32))
        logits = jnp.dot(pooled.astype(w2_ref.dtype), w2_ref[...],
                         preferred_element_type=jnp.float32)  # (tb, L_pad)
        logits = logits + b2_ref[...].astype(jnp.float32)
        out_ref[...] = logits.astype(out_ref.dtype)

    return head_kernel


def cross_encoder_concat_head(hidden_states, speical_token_pos, w1, b1, w2, b2,
                              *, batch_tile=8):
    """ContextConcat.forward (eval) + classifier, fused in one pallas_call."""
    B, S, H = hidden_states.shape
    T = speical_token_pos.shape[1]
    L = w2.shape[1]

    tb = min(batch_tile, B)
    n_tiles = pl.cdiv(B, tb)
    B_pad = n_tiles * tb
    L_pad = ((L + 127) // 128) * 128               # lane-dense output width

    # Zero-pad the classifier to a lane-dense (H, L_pad); sliced back below.
    w2_pad = jnp.zeros((H, L_pad), dtype=w2.dtype).at[:, :L].set(w2)
    b2_pad = jnp.zeros((1, L_pad), dtype=b2.dtype).at[:, :L].set(b2.reshape(1, L))
    b1 = b1.reshape(1, H)

    # Clamp gather positions: TPU does no runtime bounds check on refs.
    pos = jnp.clip(speical_token_pos, 0, S - 1).astype(jnp.int32)

    kernel = _make_head_kernel(B, S, H, T, tb)

    grid_spec = pltpu.PrefetchScalarGridSpec(
        num_scalar_prefetch=1,                      # positions -> SMEM
        grid=(n_tiles,),
        in_specs=[
            pl.BlockSpec(memory_space=pl.ANY),              # hidden_states: HBM
            pl.BlockSpec((T * H, H), lambda i, p: (0, 0)),  # resident weights
            pl.BlockSpec((1, H), lambda i, p: (0, 0)),
            pl.BlockSpec((H, L_pad), lambda i, p: (0, 0)),
            pl.BlockSpec((1, L_pad), lambda i, p: (0, 0)),
        ],
        out_specs=pl.BlockSpec((tb, L_pad), lambda i, p: (i, 0)),
        scratch_shapes=[
            pltpu.VMEM((tb, T * H), hidden_states.dtype),   # gathered context
            pltpu.SemaphoreType.DMA((tb, T)),
        ],
    )

    out = pl.pallas_call(
        kernel,
        out_shape=jax.ShapeDtypeStruct((B_pad, L_pad), jnp.float32),
        grid_spec=grid_spec,
        compiler_params=pltpu.CompilerParams(
            dimension_semantics=("parallel",),
            # Leave headroom for v7x's 64 MiB VMEM; at production H, pass bf16
            # weights (w1 dominates bytes) to stay comfortably within budget.
            vmem_limit_bytes=48 * 1024 * 1024,
        ),
    )(pos, hidden_states, w1, b1, w2_pad, b2_pad)

    return out[:B, :L]


def reference_head(hidden_states, pos, w1, b1, w2, b2):
    """Pure-JAX replica of ContextConcat.forward + classifier (eval mode)."""
    B, S, H = hidden_states.shape
    T = pos.shape[1]
    pos = jnp.clip(pos, 0, S - 1)
    ctx = hidden_states[jnp.arange(B)[:, None], pos].reshape(B, T * H)
    ctx = ctx.astype(w1.dtype)
    pooled = jnp.tanh(jnp.dot(ctx, w1, preferred_element_type=jnp.float32)
                      + b1.reshape(1, H).astype(jnp.float32))
    logits = jnp.dot(pooled.astype(w2.dtype), w2,
                     preferred_element_type=jnp.float32)
    return logits + b2.reshape(1, -1).astype(jnp.float32)


if __name__ == "__main__":
    # Small, forward-consistent shapes (lane-aligned hidden size).
    B, S, H = 2, 16, 128         # batch, seq, hidden_size
    T = 6                        # num_text_types (special tokens gathered)
    L = 2                        # num_labels
    VOCAB = 100
    initializer_range = 0.02

    key = jax.random.PRNGKey(0)
    k_emb, k_ids, k_pos, k_w1, k_w2 = jax.random.split(key, 5)

    # --- deterministic stand-in for the pretrained backbone ---------------
    emb_table = jax.random.normal(k_emb, (VOCAB, H), dtype=jnp.float32) * 0.1
    input_ids = jax.random.randint(k_ids, (B, S), 0, VOCAB, dtype=jnp.int32)
    hidden_states = emb_table[input_ids]                     # (B, S, H) f32
    speical_token_pos = jax.random.randint(k_pos, (B, T), 0, S, dtype=jnp.int32)

    # --- head parameters (deterministic init, matching __init__) ----------
    w1 = jax.random.normal(k_w1, (T * H, H), dtype=jnp.float32) * initializer_range
    b1 = jnp.zeros((1, H), dtype=jnp.float32)
    w2 = jax.random.normal(k_w2, (H, L), dtype=jnp.float32) * initializer_range
    b2 = jnp.zeros((1, L), dtype=jnp.float32)

    # --- f32 weights -------------------------------------------------------
    logits = cross_encoder_concat_head(
        hidden_states, speical_token_pos, w1, b1, w2, b2)
    logits = jax.block_until_ready(logits)
    ref = reference_head(hidden_states, speical_token_pos, w1, b1, w2, b2)
    assert logits.shape == (B, L)
    assert jnp.allclose(logits, ref, rtol=1e-5, atol=1e-5), (logits, ref)

    # --- bf16 weights (half the w1 HBM bytes, bf16 MXU rate; f32 accum) ----
    w1_bf, b1_bf = w1.astype(jnp.bfloat16), b1.astype(jnp.bfloat16)
    w2_bf, b2_bf = w2.astype(jnp.bfloat16), b2.astype(jnp.bfloat16)
    logits_bf = cross_encoder_concat_head(
        hidden_states, speical_token_pos, w1_bf, b1_bf, w2_bf, b2_bf)
    logits_bf = jax.block_until_ready(logits_bf)
    ref_bf = reference_head(hidden_states, speical_token_pos,
                            w1_bf, b1_bf, w2_bf, b2_bf)
    assert jnp.allclose(logits_bf, ref_bf, rtol=1e-2, atol=1e-4), (logits_bf, ref_bf)

    print("KERNEL_OK")
</pallas_src>

<mosaic_0001>
module attributes {stable_mosaic.version = 11 : i64} {
  func.func @head_kernel(%arg0: i32, %arg1: memref<2x6xi32, #tpu.memory_space<smem>>, %arg2: memref<2x16x128xf32, #tpu.memory_space<any>>, %arg3: memref<768x128xf32, #tpu.memory_space<vmem>>, %arg4: memref<1x128xf32, #tpu.memory_space<vmem>>, %arg5: memref<128x128xf32, #tpu.memory_space<vmem>>, %arg6: memref<1x128xf32, #tpu.memory_space<vmem>>, %arg7: memref<2x128xf32, #tpu.memory_space<vmem>>, %arg8: memref<2x768xf32, #tpu.memory_space<vmem>>, %arg9: memref<2x6x!tpu.dma_semaphore, #tpu.memory_space<semaphore_mem>>) attributes {dimension_semantics = [#tpu.dimension_semantics<parallel>], iteration_bounds = array<i64: 1>, scalar_prefetch = 1 : i64, scratch_operands = 2 : i64, tpu.core_type = #tpu.core_type<tc>, window_params = [{}, {pipeline_mode = #tpu.pipeline_mode<synchronous>, transform_indices = @transform_1, window_bounds = array<i64: 768, 128>}, {pipeline_mode = #tpu.pipeline_mode<synchronous>, transform_indices = @transform_2, window_bounds = array<i64: 1, 128>}, {pipeline_mode = #tpu.pipeline_mode<synchronous>, transform_indices = @transform_3, window_bounds = array<i64: 128, 128>}, {pipeline_mode = #tpu.pipeline_mode<synchronous>, transform_indices = @transform_4, window_bounds = array<i64: 1, 128>}, {transform_indices = @transform_5, window_bounds = array<i64: 2, 128>}]} {
    %c2_i32 = arith.constant 2 : i32
    %0 = arith.muli %arg0, %c2_i32 : i32
    %c0_i32 = arith.constant 0 : i32
    %1 = arith.addi %0, %c0_i32 : i32
    %c1_i32 = arith.constant 1 : i32
    %2 = arith.minsi %1, %c1_i32 : i32
    %3 = arith.index_cast %2 : i32 to index
    %c0 = arith.constant 0 : index
    %4 = memref.load %arg1[%3, %c0] : memref<2x6xi32, #tpu.memory_space<smem>>
    %5 = arith.index_cast %2 : i32 to index
    %c1 = arith.constant 1 : index
    %6 = memref.load %arg1[%5, %c1] : memref<2x6xi32, #tpu.memory_space<smem>>
    %7 = arith.index_cast %2 : i32 to index
    %c2 = arith.constant 2 : index
    %8 = memref.load %arg1[%7, %c2] : memref<2x6xi32, #tpu.memory_space<smem>>
    %9 = arith.index_cast %2 : i32 to index
    %c3 = arith.constant 3 : index
    %10 = memref.load %arg1[%9, %c3] : memref<2x6xi32, #tpu.memory_space<smem>>
    %11 = arith.index_cast %2 : i32 to index
    %c4 = arith.constant 4 : index
    %12 = memref.load %arg1[%11, %c4] : memref<2x6xi32, #tpu.memory_space<smem>>
    %13 = arith.index_cast %2 : i32 to index
    %c5 = arith.constant 5 : index
    %14 = memref.load %arg1[%13, %c5] : memref<2x6xi32, #tpu.memory_space<smem>>
    %c2_i32_0 = arith.constant 2 : i32
    %15 = arith.muli %arg0, %c2_i32_0 : i32
    %c1_i32_1 = arith.constant 1 : i32
    %16 = arith.addi %15, %c1_i32_1 : i32
    %c1_i32_2 = arith.constant 1 : i32
    %17 = arith.minsi %16, %c1_i32_2 : i32
    %18 = arith.index_cast %17 : i32 to index
    %c0_3 = arith.constant 0 : index
    %19 = memref.load %arg1[%18, %c0_3] : memref<2x6xi32, #tpu.memory_space<smem>>
    %20 = arith.index_cast %17 : i32 to index
    %c1_4 = arith.constant 1 : index
    %21 = memref.load %arg1[%20, %c1_4] : memref<2x6xi32, #tpu.memory_space<smem>>
    %22 = arith.index_cast %17 : i32 to index
    %c2_5 = arith.constant 2 : index
    %23 = memref.load %arg1[%22, %c2_5] : memref<2x6xi32, #tpu.memory_space<smem>>
    %24 = arith.index_cast %17 : i32 to index
    %c3_6 = arith.constant 3 : index
    %25 = memref.load %arg1[%24, %c3_6] : memref<2x6xi32, #tpu.memory_space<smem>>
    %26 = arith.index_cast %17 : i32 to index
    %c4_7 = arith.constant 4 : index
    %27 = memref.load %arg1[%26, %c4_7] : memref<2x6xi32, #tpu.memory_space<smem>>
    %28 = arith.index_cast %17 : i32 to index
    %c5_8 = arith.constant 5 : index
    %29 = memref.load %arg1[%28, %c5_8] : memref<2x6xi32, #tpu.memory_space<smem>>
    %c0_i32_9 = arith.constant 0 : i32
    %c0_i32_10 = arith.constant 0 : i32
    %c0_i32_11 = arith.constant 0 : i32
    %30 = tpu.memref_slice %arg2[%2, %4, %c0_i32_11] : memref<2x16x128xf32, #tpu.memory_space<any>> -> memref<1x1x128xf32, #tpu.memory_space<any>>
    %31 = tpu.memref_squeeze %30 : memref<1x1x128xf32, #tpu.memory_space<any>> -> memref<1x128xf32, #tpu.memory_space<any>>
    %c0_i32_12 = arith.constant 0 : i32
    %c0_i32_13 = arith.constant 0 : i32
    %32 = tpu.memref_slice %arg8[%c0_i32_12, %c0_i32_13] : memref<2x768xf32, #tpu.memory_space<vmem>> -> memref<1x128xf32, #tpu.memory_space<vmem>>
    %33 = tpu.memref_slice %arg9[%c0_i32_9, %c0_i32_10] : memref<2x6x!tpu.dma_semaphore, #tpu.memory_space<semaphore_mem>> -> memref<1x1x!tpu.dma_semaphore, #tpu.memory_space<semaphore_mem>>
    %34 = tpu.memref_squeeze %33 : memref<1x1x!tpu.dma_semaphore, #tpu.memory_space<semaphore_mem>> -> memref<!tpu.dma_semaphore, #tpu.memory_space<semaphore_mem>>
    tpu.enqueue_dma source(%31 : memref<1x128xf32, #tpu.memory_space<any>>) target(%32 : memref<1x128xf32, #tpu.memory_space<vmem>>) target_semaphore(%34 : memref<!tpu.dma_semaphore, #tpu.memory_space<semaphore_mem>>)
    %c0_i32_14 = arith.constant 0 : i32
    %c1_i32_15 = arith.constant 1 : i32
    %c0_i32_16 = arith.constant 0 : i32
    %35 = tpu.memref_slice %arg2[%2, %6, %c0_i32_16] : memref<2x16x128xf32, #tpu.memory_space<any>> -> memref<1x1x128xf32, #tpu.memory_space<any>>
    %36 = tpu.memref_squeeze %35 : memref<1x1x128xf32, #tpu.memory_space<any>> -> memref<1x128xf32, #tpu.memory_space<any>>
    %c0_i32_17 = arith.constant 0 : i32
    %c128_i32 = arith.constant 128 : i32
    %37 = tpu.memref_slice %arg8[%c0_i32_17, %c128_i32] : memref<2x768xf32, #tpu.memory_space<vmem>> -> memref<1x128xf32, #tpu.memory_space<vmem>>
    %38 = tpu.memref_slice %arg9[%c0_i32_14, %c1_i32_15] : memref<2x6x!tpu.dma_semaphore, #tpu.memory_space<semaphore_mem>> -> memref<1x1x!tpu.dma_semaphore, #tpu.memory_space<semaphore_mem>>
    %39 = tpu.memref_squeeze %38 : memref<1x1x!tpu.dma_semaphore, #tpu.memory_space<semaphore_mem>> -> memref<!tpu.dma_semaphore, #tpu.memory_space<semaphore_mem>>
    tpu.enqueue_dma source(%36 : memref<1x128xf32, #tpu.memory_space<any>>) target(%37 : memref<1x128xf32, #tpu.memory_space<vmem>>) target_semaphore(%39 : memref<!tpu.dma_semaphore, #tpu.memory_space<semaphore_mem>>)
    %c0_i32_18 = arith.constant 0 : i32
    %c2_i32_19 = arith.constant 2 : i32
    %c0_i32_20 = arith.constant 0 : i32
    %40 = tpu.memref_slice %arg2[%2, %8, %c0_i32_20] : memref<2x16x128xf32, #tpu.memory_space<any>> -> memref<1x1x128xf32, #tpu.memory_space<any>>
    %41 = tpu.memref_squeeze %40 : memref<1x1x128xf32, #tpu.memory_space<any>> -> memref<1x128xf32, #tpu.memory_space<any>>
    %c0_i32_21 = arith.constant 0 : i32
    %c256_i32 = arith.constant 256 : i32
    %42 = tpu.memref_slice %arg8[%c0_i32_21, %c256_i32] : memref<2x768xf32, #tpu.memory_space<vmem>> -> memref<1x128xf32, #tpu.memory_space<vmem>>
    %43 = tpu.memref_slice %arg9[%c0_i32_18, %c2_i32_19] : memref<2x6x!tpu.dma_semaphore, #tpu.memory_space<semaphore_mem>> -> memref<1x1x!tpu.dma_semaphore, #tpu.memory_space<semaphore_mem>>
    %44 = tpu.memref_squeeze %43 : memref<1x1x!tpu.dma_semaphore, #tpu.memory_space<semaphore_mem>> -> memref<!tpu.dma_semaphore, #tpu.memory_space<semaphore_mem>>
    tpu.enqueue_dma source(%41 : memref<1x128xf32, #tpu.memory_space<any>>) target(%42 : memref<1x128xf32, #tpu.memory_space<vmem>>) target_semaphore(%44 : memref<!tpu.dma_semaphore, #tpu.memory_space<semaphore_mem>>)
    %c0_i32_22 = arith.constant 0 : i32
    %c3_i32 = arith.constant 3 : i32
    %c0_i32_23 = arith.constant 0 : i32
    %45 = tpu.memref_slice %arg2[%2, %10, %c0_i32_23] : memref<2x16x128xf32, #tpu.memory_space<any>> -> memref<1x1x128xf32, #tpu.memory_space<any>>
    %46 = tpu.memref_squeeze %45 : memref<1x1x128xf32, #tpu.memory_space<any>> -> memref<1x128xf32, #tpu.memory_space<any>>
    %c0_i32_24 = arith.constant 0 : i32
    %c384_i32 = arith.constant 384 : i32
    %47 = tpu.memref_slice %arg8[%c0_i32_24, %c384_i32] : memref<2x768xf32, #tpu.memory_space<vmem>> -> memref<1x128xf32, #tpu.memory_space<vmem>>
    %48 = tpu.memref_slice %arg9[%c0_i32_22, %c3_i32] : memref<2x6x!tpu.dma_semaphore, #tpu.memory_space<semaphore_mem>> -> memref<1x1x!tpu.dma_semaphore, #tpu.memory_space<semaphore_mem>>
    %49 = tpu.memref_squeeze %48 : memref<1x1x!tpu.dma_semaphore, #tpu.memory_space<semaphore_mem>> -> memref<!tpu.dma_semaphore, #tpu.memory_space<semaphore_mem>>
    tpu.enqueue_dma source(%46 : memref<1x128xf32, #tpu.memory_space<any>>) target(%47 : memref<1x128xf32, #tpu.memory_space<vmem>>) target_semaphore(%49 : memref<!tpu.dma_semaphore, #tpu.memory_space<semaphore_mem>>)
    %c0_i32_25 = arith.constant 0 : i32
    %c4_i32 = arith.constant 4 : i32
    %c0_i32_26 = arith.constant 0 : i32
    %50 = tpu.memref_slice %arg2[%2, %12, %c0_i32_26] : memref<2x16x128xf32, #tpu.memory_space<any>> -> memref<1x1x128xf32, #tpu.memory_space<any>>
    %51 = tpu.memref_squeeze %50 : memref<1x1x128xf32, #tpu.memory_space<any>> -> memref<1x128xf32, #tpu.memory_space<any>>
    %c0_i32_27 = arith.constant 0 : i32
    %c512_i32 = arith.constant 512 : i32
    %52 = tpu.memref_slice %arg8[%c0_i32_27, %c512_i32] : memref<2x768xf32, #tpu.memory_space<vmem>> -> memref<1x128xf32, #tpu.memory_space<vmem>>
    %53 = tpu.memref_slice %arg9[%c0_i32_25, %c4_i32] : memref<2x6x!tpu.dma_semaphore, #tpu.memory_space<semaphore_mem>> -> memref<1x1x!tpu.dma_semaphore, #tpu.memory_space<semaphore_mem>>
    %54 = tpu.memref_squeeze %53 : memref<1x1x!tpu.dma_semaphore, #tpu.memory_space<semaphore_mem>> -> memref<!tpu.dma_semaphore, #tpu.memory_space<semaphore_mem>>
    tpu.enqueue_dma source(%51 : memref<1x128xf32, #tpu.memory_space<any>>) target(%52 : memref<1x128xf32, #tpu.memory_space<vmem>>) target_semaphore(%54 : memref<!tpu.dma_semaphore, #tpu.memory_space<semaphore_mem>>)
    %c0_i32_28 = arith.constant 0 : i32
    %c5_i32 = arith.constant 5 : i32
    %c0_i32_29 = arith.constant 0 : i32
    %55 = tpu.memref_slice %arg2[%2, %14, %c0_i32_29] : memref<2x16x128xf32, #tpu.memory_space<any>> -> memref<1x1x128xf32, #tpu.memory_space<any>>
    %56 = tpu.memref_squeeze %55 : memref<1x1x128xf32, #tpu.memory_space<any>> -> memref<1x128xf32, #tpu.memory_space<any>>
    %c0_i32_30 = arith.constant 0 : i32
    %c640_i32 = arith.constant 640 : i32
    %57 = tpu.memref_slice %arg8[%c0_i32_30, %c640_i32] : memref<2x768xf32, #tpu.memory_space<vmem>> -> memref<1x128xf32, #tpu.memory_space<vmem>>
    %58 = tpu.memref_slice %arg9[%c0_i32_28, %c5_i32] : memref<2x6x!tpu.dma_semaphore, #tpu.memory_space<semaphore_mem>> -> memref<1x1x!tpu.dma_semaphore, #tpu.memory_space<semaphore_mem>>
    %59 = tpu.memref_squeeze %58 : memref<1x1x!tpu.dma_semaphore, #tpu.memory_space<semaphore_mem>> -> memref<!tpu.dma_semaphore, #tpu.memory_space<semaphore_mem>>
    tpu.enqueue_dma source(%56 : memref<1x128xf32, #tpu.memory_space<any>>) target(%57 : memref<1x128xf32, #tpu.memory_space<vmem>>) target_semaphore(%59 : memref<!tpu.dma_semaphore, #tpu.memory_space<semaphore_mem>>)
    %c1_i32_31 = arith.constant 1 : i32
    %c0_i32_32 = arith.constant 0 : i32
    %c0_i32_33 = arith.constant 0 : i32
    %60 = tpu.memref_slice %arg2[%17, %19, %c0_i32_33] : memref<2x16x128xf32, #tpu.memory_space<any>> -> memref<1x1x128xf32, #tpu.memory_space<any>>
    %61 = tpu.memref_squeeze %60 : memref<1x1x128xf32, #tpu.memory_space<any>> -> memref<1x128xf32, #tpu.memory_space<any>>
    %c1_i32_34 = arith.constant 1 : i32
    %c0_i32_35 = arith.constant 0 : i32
    %62 = tpu.memref_slice %arg8[%c1_i32_34, %c0_i32_35] : memref<2x768xf32, #tpu.memory_space<vmem>> -> memref<1x128xf32, #tpu.memory_space<vmem>>
    %63 = tpu.memref_slice %arg9[%c1_i32_31, %c0_i32_32] : memref<2x6x!tpu.dma_semaphore, #tpu.memory_space<semaphore_mem>> -> memref<1x1x!tpu.dma_semaphore, #tpu.memory_space<semaphore_mem>>
    %64 = tpu.memref_squeeze %63 : memref<1x1x!tpu.dma_semaphore, #tpu.memory_space<semaphore_mem>> -> memref<!tpu.dma_semaphore, #tpu.memory_space<semaphore_mem>>
    tpu.enqueue_dma source(%61 : memref<1x128xf32, #tpu.memory_space<any>>) target(%62 : memref<1x128xf32, #tpu.memory_space<vmem>>) target_semaphore(%64 : memref<!tpu.dma_semaphore, #tpu.memory_space<semaphore_mem>>)
    %c1_i32_36 = arith.constant 1 : i32
    %c1_i32_37 = arith.constant 1 : i32
    %c0_i32_38 = arith.constant 0 : i32
    %65 = tpu.memref_slice %arg2[%17, %21, %c0_i32_38] : memref<2x16x128xf32, #tpu.memory_space<any>> -> memref<1x1x128xf32, #tpu.memory_space<any>>
    %66 = tpu.memref_squeeze %65 : memref<1x1x128xf32, #tpu.memory_space<any>> -> memref<1x128xf32, #tpu.memory_space<any>>
    %c1_i32_39 = arith.constant 1 : i32
    %c128_i32_40 = arith.constant 128 : i32
    %67 = tpu.memref_slice %arg8[%c1_i32_39, %c128_i32_40] : memref<2x768xf32, #tpu.memory_space<vmem>> -> memref<1x128xf32, #tpu.memory_space<vmem>>
    %68 = tpu.memref_slice %arg9[%c1_i32_36, %c1_i32_37] : memref<2x6x!tpu.dma_semaphore, #tpu.memory_space<semaphore_mem>> -> memref<1x1x!tpu.dma_semaphore, #tpu.memory_space<semaphore_mem>>
    %69 = tpu.memref_squeeze %68 : memref<1x1x!tpu.dma_semaphore, #tpu.memory_space<semaphore_mem>> -> memref<!tpu.dma_semaphore, #tpu.memory_space<semaphore_mem>>
    tpu.enqueue_dma source(%66 : memref<1x128xf32, #tpu.memory_space<any>>) target(%67 : memref<1x128xf32, #tpu.memory_space<vmem>>) target_semaphore(%69 : memref<!tpu.dma_semaphore, #tpu.memory_space<semaphore_mem>>)
    %c1_i32_41 = arith.constant 1 : i32
    %c2_i32_42 = arith.constant 2 : i32
    %c0_i32_43 = arith.constant 0 : i32
    %70 = tpu.memref_slice %arg2[%17, %23, %c0_i32_43] : memref<2x16x128xf32, #tpu.memory_space<any>> -> memref<1x1x128xf32, #tpu.memory_space<any>>
    %71 = tpu.memref_squeeze %70 : memref<1x1x128xf32, #tpu.memory_space<any>> -> memref<1x128xf32, #tpu.memory_space<any>>
    %c1_i32_44 = arith.constant 1 : i32
    %c256_i32_45 = arith.constant 256 : i32
    %72 = tpu.memref_slice %arg8[%c1_i32_44, %c256_i32_45] : memref<2x768xf32, #tpu.memory_space<vmem>> -> memref<1x128xf32, #tpu.memory_space<vmem>>
    %73 = tpu.memref_slice %arg9[%c1_i32_41, %c2_i32_42] : memref<2x6x!tpu.dma_semaphore, #tpu.memory_space<semaphore_mem>> -> memref<1x1x!tpu.dma_semaphore, #tpu.memory_space<semaphore_mem>>
    %74 = tpu.memref_squeeze %73 : memref<1x1x!tpu.dma_semaphore, #tpu.memory_space<semaphore_mem>> -> memref<!tpu.dma_semaphore, #tpu.memory_space<semaphore_mem>>
    tpu.enqueue_dma source(%71 : memref<1x128xf32, #tpu.memory_space<any>>) target(%72 : memref<1x128xf32, #tpu.memory_space<vmem>>) target_semaphore(%74 : memref<!tpu.dma_semaphore, #tpu.memory_space<semaphore_mem>>)
    %c1_i32_46 = arith.constant 1 : i32
    %c3_i32_47 = arith.constant 3 : i32
    %c0_i32_48 = arith.constant 0 : i32
    %75 = tpu.memref_slice %arg2[%17, %25, %c0_i32_48] : memref<2x16x128xf32, #tpu.memory_space<any>> -> memref<1x1x128xf32, #tpu.memory_space<any>>
    %76 = tpu.memref_squeeze %75 : memref<1x1x128xf32, #tpu.memory_space<any>> -> memref<1x128xf32, #tpu.memory_space<any>>
    %c1_i32_49 = arith.constant 1 : i32
    %c384_i32_50 = arith.constant 384 : i32
    %77 = tpu.memref_slice %arg8[%c1_i32_49, %c384_i32_50] : memref<2x768xf32, #tpu.memory_space<vmem>> -> memref<1x128xf32, #tpu.memory_space<vmem>>
    %78 = tpu.memref_slice %arg9[%c1_i32_46, %c3_i32_47] : memref<2x6x!tpu.dma_semaphore, #tpu.memory_space<semaphore_mem>> -> memref<1x1x!tpu.dma_semaphore, #tpu.memory_space<semaphore_mem>>
    %79 = tpu.memref_squeeze %78 : memref<1x1x!tpu.dma_semaphore, #tpu.memory_space<semaphore_mem>> -> memref<!tpu.dma_semaphore, #tpu.memory_space<semaphore_mem>>
    tpu.enqueue_dma source(%76 : memref<1x128xf32, #tpu.memory_space<any>>) target(%77 : memref<1x128xf32, #tpu.memory_space<vmem>>) target_semaphore(%79 : memref<!tpu.dma_semaphore, #tpu.memory_space<semaphore_mem>>)
    %c1_i32_51 = arith.constant 1 : i32
    %c4_i32_52 = arith.constant 4 : i32
    %c0_i32_53 = arith.constant 0 : i32
    %80 = tpu.memref_slice %arg2[%17, %27, %c0_i32_53] : memref<2x16x128xf32, #tpu.memory_space<any>> -> memref<1x1x128xf32, #tpu.memory_space<any>>
    %81 = tpu.memref_squeeze %80 : memref<1x1x128xf32, #tpu.memory_space<any>> -> memref<1x128xf32, #tpu.memory_space<any>>
    %c1_i32_54 = arith.constant 1 : i32
    %c512_i32_55 = arith.constant 512 : i32
    %82 = tpu.memref_slice %arg8[%c1_i32_54, %c512_i32_55] : memref<2x768xf32, #tpu.memory_space<vmem>> -> memref<1x128xf32, #tpu.memory_space<vmem>>
    %83 = tpu.memref_slice %arg9[%c1_i32_51, %c4_i32_52] : memref<2x6x!tpu.dma_semaphore, #tpu.memory_space<semaphore_mem>> -> memref<1x1x!tpu.dma_semaphore, #tpu.memory_space<semaphore_mem>>
    %84 = tpu.memref_squeeze %83 : memref<1x1x!tpu.dma_semaphore, #tpu.memory_space<semaphore_mem>> -> memref<!tpu.dma_semaphore, #tpu.memory_space<semaphore_mem>>
    tpu.enqueue_dma source(%81 : memref<1x128xf32, #tpu.memory_space<any>>) target(%82 : memref<1x128xf32, #tpu.memory_space<vmem>>) target_semaphore(%84 : memref<!tpu.dma_semaphore, #tpu.memory_space<semaphore_mem>>)
    %c1_i32_56 = arith.constant 1 : i32
    %c5_i32_57 = arith.constant 5 : i32
    %c0_i32_58 = arith.constant 0 : i32
    %85 = tpu.memref_slice %arg2[%17, %29, %c0_i32_58] : memref<2x16x128xf32, #tpu.memory_space<any>> -> memref<1x1x128xf32, #tpu.memory_space<any>>
    %86 = tpu.memref_squeeze %85 : memref<1x1x128xf32, #tpu.memory_space<any>> -> memref<1x128xf32, #tpu.memory_space<any>>
    %c1_i32_59 = arith.constant 1 : i32
    %c640_i32_60 = arith.constant 640 : i32
    %87 = tpu.memref_slice %arg8[%c1_i32_59, %c640_i32_60] : memref<2x768xf32, #tpu.memory_space<vmem>> -> memref<1x128xf32, #tpu.memory_space<vmem>>
    %88 = tpu.memref_slice %arg9[%c1_i32_56, %c5_i32_57] : memref<2x6x!tpu.dma_semaphore, #tpu.memory_space<semaphore_mem>> -> memref<1x1x!tpu.dma_semaphore, #tpu.memory_space<semaphore_mem>>
    %89 = tpu.memref_squeeze %88 : memref<1x1x!tpu.dma_semaphore, #tpu.memory_space<semaphore_mem>> -> memref<!tpu.dma_semaphore, #tpu.memory_space<semaphore_mem>>
    tpu.enqueue_dma source(%86 : memref<1x128xf32, #tpu.memory_space<any>>) target(%87 : memref<1x128xf32, #tpu.memory_space<vmem>>) target_semaphore(%89 : memref<!tpu.dma_semaphore, #tpu.memory_space<semaphore_mem>>)
    %c0_i32_61 = arith.constant 0 : i32
    %c0_i32_62 = arith.constant 0 : i32
    %c0_i32_63 = arith.constant 0 : i32
    %90 = tpu.memref_slice %arg2[%2, %4, %c0_i32_63] : memref<2x16x128xf32, #tpu.memory_space<any>> -> memref<1x1x128xf32, #tpu.memory_space<any>>
    %91 = tpu.memref_squeeze %90 : memref<1x1x128xf32, #tpu.memory_space<any>> -> memref<1x128xf32, #tpu.memory_space<any>>
    %c0_i32_64 = arith.constant 0 : i32
    %c0_i32_65 = arith.constant 0 : i32
    %92 = tpu.memref_slice %arg8[%c0_i32_64, %c0_i32_65] : memref<2x768xf32, #tpu.memory_space<vmem>> -> memref<1x128xf32, #tpu.memory_space<vmem>>
    %93 = tpu.memref_slice %arg9[%c0_i32_61, %c0_i32_62] : memref<2x6x!tpu.dma_semaphore, #tpu.memory_space<semaphore_mem>> -> memref<1x1x!tpu.dma_semaphore, #tpu.memory_space<semaphore_mem>>
    %94 = tpu.memref_squeeze %93 : memref<1x1x!tpu.dma_semaphore, #tpu.memory_space<semaphore_mem>> -> memref<!tpu.dma_semaphore, #tpu.memory_space<semaphore_mem>>
    tpu.wait_dma2 semaphore(%94 : memref<!tpu.dma_semaphore, #tpu.memory_space<semaphore_mem>>) src(%91 : memref<1x128xf32, #tpu.memory_space<any>>) dst(%92 : memref<1x128xf32, #tpu.memory_space<vmem>>)
    %c0_i32_66 = arith.constant 0 : i32
    %c1_i32_67 = arith.constant 1 : i32
    %c0_i32_68 = arith.constant 0 : i32
    %95 = tpu.memref_slice %arg2[%2, %6, %c0_i32_68] : memref<2x16x128xf32, #tpu.memory_space<any>> -> memref<1x1x128xf32, #tpu.memory_space<any>>
    %96 = tpu.memref_squeeze %95 : memref<1x1x128xf32, #tpu.memory_space<any>> -> memref<1x128xf32, #tpu.memory_space<any>>
    %c0_i32_69 = arith.constant 0 : i32
    %c128_i32_70 = arith.constant 128 : i32
    %97 = tpu.memref_slice %arg8[%c0_i32_69, %c128_i32_70] : memref<2x768xf32, #tpu.memory_space<vmem>> -> memref<1x128xf32, #tpu.memory_space<vmem>>
    %98 = tpu.memref_slice %arg9[%c0_i32_66, %c1_i32_67] : memref<2x6x!tpu.dma_semaphore, #tpu.memory_space<semaphore_mem>> -> memref<1x1x!tpu.dma_semaphore, #tpu.memory_space<semaphore_mem>>
    %99 = tpu.memref_squeeze %98 : memref<1x1x!tpu.dma_semaphore, #tpu.memory_space<semaphore_mem>> -> memref<!tpu.dma_semaphore, #tpu.memory_space<semaphore_mem>>
    tpu.wait_dma2 semaphore(%99 : memref<!tpu.dma_semaphore, #tpu.memory_space<semaphore_mem>>) src(%96 : memref<1x128xf32, #tpu.memory_space<any>>) dst(%97 : memref<1x128xf32, #tpu.memory_space<vmem>>)
    %c0_i32_71 = arith.constant 0 : i32
    %c2_i32_72 = arith.constant 2 : i32
    %c0_i32_73 = arith.constant 0 : i32
    %100 = tpu.memref_slice %arg2[%2, %8, %c0_i32_73] : memref<2x16x128xf32, #tpu.memory_space<any>> -> memref<1x1x128xf32, #tpu.memory_space<any>>
    %101 = tpu.memref_squeeze %100 : memref<1x1x128xf32, #tpu.memory_space<any>> -> memref<1x128xf32, #tpu.memory_space<any>>
    %c0_i32_74 = arith.constant 0 : i32
    %c256_i32_75 = arith.constant 256 : i32
    %102 = tpu.memref_slice %arg8[%c0_i32_74, %c256_i32_75] : memref<2x768xf32, #tpu.memory_space<vmem>> -> memref<1x128xf32, #tpu.memory_space<vmem>>
    %103 = tpu.memref_slice %arg9[%c0_i32_71, %c2_i32_72] : memref<2x6x!tpu.dma_semaphore, #tpu.memory_space<semaphore_mem>> -> memref<1x1x!tpu.dma_semaphore, #tpu.memory_space<semaphore_mem>>
    %104 = tpu.memref_squeeze %103 : memref<1x1x!tpu.dma_semaphore, #tpu.memory_space<semaphore_mem>> -> memref<!tpu.dma_semaphore, #tpu.memory_space<semaphore_mem>>
    tpu.wait_dma2 semaphore(%104 : memref<!tpu.dma_semaphore, #tpu.memory_space<semaphore_mem>>) src(%101 : memref<1x128xf32, #tpu.memory_space<any>>) dst(%102 : memref<1x128xf32, #tpu.memory_space<vmem>>)
    %c0_i32_76 = arith.constant 0 : i32
    %c3_i32_77 = arith.constant 3 : i32
    %c0_i32_78 = arith.constant 0 : i32
    %105 = tpu.memref_slice %arg2[%2, %10, %c0_i32_78] : memref<2x16x128xf32, #tpu.memory_space<any>> -> memref<1x1x128xf32, #tpu.memory_space<any>>
    %106 = tpu.memref_squeeze %105 : memref<1x1x128xf32, #tpu.memory_space<any>> -> memref<1x128xf32, #tpu.memory_space<any>>
    %c0_i32_79 = arith.constant 0 : i32
    %c384_i32_80 = arith.constant 384 : i32
    %107 = tpu.memref_slice %arg8[%c0_i32_79, %c384_i32_80] : memref<2x768xf32, #tpu.memory_space<vmem>> -> memref<1x128xf32, #tpu.memory_space<vmem>>
    %108 = tpu.memref_slice %arg9[%c0_i32_76, %c3_i32_77] : memref<2x6x!tpu.dma_semaphore, #tpu.memory_space<semaphore_mem>> -> memref<1x1x!tpu.dma_semaphore, #tpu.memory_space<semaphore_mem>>
    %109 = tpu.memref_squeeze %108 : memref<1x1x!tpu.dma_semaphore, #tpu.memory_space<semaphore_mem>> -> memref<!tpu.dma_semaphore, #tpu.memory_space<semaphore_mem>>
    tpu.wait_dma2 semaphore(%109 : memref<!tpu.dma_semaphore, #tpu.memory_space<semaphore_mem>>) src(%106 : memref<1x128xf32, #tpu.memory_space<any>>) dst(%107 : memref<1x128xf32, #tpu.memory_space<vmem>>)
    %c0_i32_81 = arith.constant 0 : i32
    %c4_i32_82 = arith.constant 4 : i32
    %c0_i32_83 = arith.constant 0 : i32
    %110 = tpu.memref_slice %arg2[%2, %12, %c0_i32_83] : memref<2x16x128xf32, #tpu.memory_space<any>> -> memref<1x1x128xf32, #tpu.memory_space<any>>
    %111 = tpu.memref_squeeze %110 : memref<1x1x128xf32, #tpu.memory_space<any>> -> memref<1x128xf32, #tpu.memory_space<any>>
    %c0_i32_84 = arith.constant 0 : i32
    %c512_i32_85 = arith.constant 512 : i32
    %112 = tpu.memref_slice %arg8[%c0_i32_84, %c512_i32_85] : memref<2x768xf32, #tpu.memory_space<vmem>> -> memref<1x128xf32, #tpu.memory_space<vmem>>
    %113 = tpu.memref_slice %arg9[%c0_i32_81, %c4_i32_82] : memref<2x6x!tpu.dma_semaphore, #tpu.memory_space<semaphore_mem>> -> memref<1x1x!tpu.dma_semaphore, #tpu.memory_space<semaphore_mem>>
    %114 = tpu.memref_squeeze %113 : memref<1x1x!tpu.dma_semaphore, #tpu.memory_space<semaphore_mem>> -> memref<!tpu.dma_semaphore, #tpu.memory_space<semaphore_mem>>
    tpu.wait_dma2 semaphore(%114 : memref<!tpu.dma_semaphore, #tpu.memory_space<semaphore_mem>>) src(%111 : memref<1x128xf32, #tpu.memory_space<any>>) dst(%112 : memref<1x128xf32, #tpu.memory_space<vmem>>)
    %c0_i32_86 = arith.constant 0 : i32
    %c5_i32_87 = arith.constant 5 : i32
    %c0_i32_88 = arith.constant 0 : i32
    %115 = tpu.memref_slice %arg2[%2, %14, %c0_i32_88] : memref<2x16x128xf32, #tpu.memory_space<any>> -> memref<1x1x128xf32, #tpu.memory_space<any>>
    %116 = tpu.memref_squeeze %115 : memref<1x1x128xf32, #tpu.memory_space<any>> -> memref<1x128xf32, #tpu.memory_space<any>>
    %c0_i32_89 = arith.constant 0 : i32
    %c640_i32_90 = arith.constant 640 : i32
    %117 = tpu.memref_slice %arg8[%c0_i32_89, %c640_i32_90] : memref<2x768xf32, #tpu.memory_space<vmem>> -> memref<1x128xf32, #tpu.memory_space<vmem>>
    %118 = tpu.memref_slice %arg9[%c0_i32_86, %c5_i32_87] : memref<2x6x!tpu.dma_semaphore, #tpu.memory_space<semaphore_mem>> -> memref<1x1x!tpu.dma_semaphore, #tpu.memory_space<semaphore_mem>>
    %119 = tpu.memref_squeeze %118 : memref<1x1x!tpu.dma_semaphore, #tpu.memory_space<semaphore_mem>> -> memref<!tpu.dma_semaphore, #tpu.memory_space<semaphore_mem>>
    tpu.wait_dma2 semaphore(%119 : memref<!tpu.dma_semaphore, #tpu.memory_space<semaphore_mem>>) src(%116 : memref<1x128xf32, #tpu.memory_space<any>>) dst(%117 : memref<1x128xf32, #tpu.memory_space<vmem>>)
    %c1_i32_91 = arith.constant 1 : i32
    %c0_i32_92 = arith.constant 0 : i32
    %c0_i32_93 = arith.constant 0 : i32
    %120 = tpu.memref_slice %arg2[%17, %19, %c0_i32_93] : memref<2x16x128xf32, #tpu.memory_space<any>> -> memref<1x1x128xf32, #tpu.memory_space<any>>
    %121 = tpu.memref_squeeze %120 : memref<1x1x128xf32, #tpu.memory_space<any>> -> memref<1x128xf32, #tpu.memory_space<any>>
    %c1_i32_94 = arith.constant 1 : i32
    %c0_i32_95 = arith.constant 0 : i32
    %122 = tpu.memref_slice %arg8[%c1_i32_94, %c0_i32_95] : memref<2x768xf32, #tpu.memory_space<vmem>> -> memref<1x128xf32, #tpu.memory_space<vmem>>
    %123 = tpu.memref_slice %arg9[%c1_i32_91, %c0_i32_92] : memref<2x6x!tpu.dma_semaphore, #tpu.memory_space<semaphore_mem>> -> memref<1x1x!tpu.dma_semaphore, #tpu.memory_space<semaphore_mem>>
    %124 = tpu.memref_squeeze %123 : memref<1x1x!tpu.dma_semaphore, #tpu.memory_space<semaphore_mem>> -> memref<!tpu.dma_semaphore, #tpu.memory_space<semaphore_mem>>
    tpu.wait_dma2 semaphore(%124 : memref<!tpu.dma_semaphore, #tpu.memory_space<semaphore_mem>>) src(%121 : memref<1x128xf32, #tpu.memory_space<any>>) dst(%122 : memref<1x128xf32, #tpu.memory_space<vmem>>)
    %c1_i32_96 = arith.constant 1 : i32
    %c1_i32_97 = arith.constant 1 : i32
    %c0_i32_98 = arith.constant 0 : i32
    %125 = tpu.memref_slice %arg2[%17, %21, %c0_i32_98] : memref<2x16x128xf32, #tpu.memory_space<any>> -> memref<1x1x128xf32, #tpu.memory_space<any>>
    %126 = tpu.memref_squeeze %125 : memref<1x1x128xf32, #tpu.memory_space<any>> -> memref<1x128xf32, #tpu.memory_space<any>>
    %c1_i32_99 = arith.constant 1 : i32
    %c128_i32_100 = arith.constant 128 : i32
    %127 = tpu.memref_slice %arg8[%c1_i32_99, %c128_i32_100] : memref<2x768xf32, #tpu.memory_space<vmem>> -> memref<1x128xf32, #tpu.memory_space<vmem>>
    %128 = tpu.memref_slice %arg9[%c1_i32_96, %c1_i32_97] : memref<2x6x!tpu.dma_semaphore, #tpu.memory_space<semaphore_mem>> -> memref<1x1x!tpu.dma_semaphore, #tpu.memory_space<semaphore_mem>>
    %129 = tpu.memref_squeeze %128 : memref<1x1x!tpu.dma_semaphore, #tpu.memory_space<semaphore_mem>> -> memref<!tpu.dma_semaphore, #tpu.memory_space<semaphore_mem>>
    tpu.wait_dma2 semaphore(%129 : memref<!tpu.dma_semaphore, #tpu.memory_space<semaphore_mem>>) src(%126 : memref<1x128xf32, #tpu.memory_space<any>>) dst(%127 : memref<1x128xf32, #tpu.memory_space<vmem>>)
    %c1_i32_101 = arith.constant 1 : i32
    %c2_i32_102 = arith.constant 2 : i32
    %c0_i32_103 = arith.constant 0 : i32
    %130 = tpu.memref_slice %arg2[%17, %23, %c0_i32_103] : memref<2x16x128xf32, #tpu.memory_space<any>> -> memref<1x1x128xf32, #tpu.memory_space<any>>
    %131 = tpu.memref_squeeze %130 : memref<1x1x128xf32, #tpu.memory_space<any>> -> memref<1x128xf32, #tpu.memory_space<any>>
    %c1_i32_104 = arith.constant 1 : i32
    %c256_i32_105 = arith.constant 256 : i32
    %132 = tpu.memref_slice %arg8[%c1_i32_104, %c256_i32_105] : memref<2x768xf32, #tpu.memory_space<vmem>> -> memref<1x128xf32, #tpu.memory_space<vmem>>
    %133 = tpu.memref_slice %arg9[%c1_i32_101, %c2_i32_102] : memref<2x6x!tpu.dma_semaphore, #tpu.memory_space<semaphore_mem>> -> memref<1x1x!tpu.dma_semaphore, #tpu.memory_space<semaphore_mem>>
    %134 = tpu.memref_squeeze %133 : memref<1x1x!tpu.dma_semaphore, #tpu.memory_space<semaphore_mem>> -> memref<!tpu.dma_semaphore, #tpu.memory_space<semaphore_mem>>
    tpu.wait_dma2 semaphore(%134 : memref<!tpu.dma_semaphore, #tpu.memory_space<semaphore_mem>>) src(%131 : memref<1x128xf32, #tpu.memory_space<any>>) dst(%132 : memref<1x128xf32, #tpu.memory_space<vmem>>)
    %c1_i32_106 = arith.constant 1 : i32
    %c3_i32_107 = arith.constant 3 : i32
    %c0_i32_108 = arith.constant 0 : i32
    %135 = tpu.memref_slice %arg2[%17, %25, %c0_i32_108] : memref<2x16x128xf32, #tpu.memory_space<any>> -> memref<1x1x128xf32, #tpu.memory_space<any>>
    %136 = tpu.memref_squeeze %135 : memref<1x1x128xf32, #tpu.memory_space<any>> -> memref<1x128xf32, #tpu.memory_space<any>>
    %c1_i32_109 = arith.constant 1 : i32
    %c384_i32_110 = arith.constant 384 : i32
    %137 = tpu.memref_slice %arg8[%c1_i32_109, %c384_i32_110] : memref<2x768xf32, #tpu.memory_space<vmem>> -> memref<1x128xf32, #tpu.memory_space<vmem>>
    %138 = tpu.memref_slice %arg9[%c1_i32_106, %c3_i32_107] : memref<2x6x!tpu.dma_semaphore, #tpu.memory_space<semaphore_mem>> -> memref<1x1x!tpu.dma_semaphore, #tpu.memory_space<semaphore_mem>>
    %139 = tpu.memref_squeeze %138 : memref<1x1x!tpu.dma_semaphore, #tpu.memory_space<semaphore_mem>> -> memref<!tpu.dma_semaphore, #tpu.memory_space<semaphore_mem>>
    tpu.wait_dma2 semaphore(%139 : memref<!tpu.dma_semaphore, #tpu.memory_space<semaphore_mem>>) src(%136 : memref<1x128xf32, #tpu.memory_space<any>>) dst(%137 : memref<1x128xf32, #tpu.memory_space<vmem>>)
    %c1_i32_111 = arith.constant 1 : i32
    %c4_i32_112 = arith.constant 4 : i32
    %c0_i32_113 = arith.constant 0 : i32
    %140 = tpu.memref_slice %arg2[%17, %27, %c0_i32_113] : memref<2x16x128xf32, #tpu.memory_space<any>> -> memref<1x1x128xf32, #tpu.memory_space<any>>
    %141 = tpu.memref_squeeze %140 : memref<1x1x128xf32, #tpu.memory_space<any>> -> memref<1x128xf32, #tpu.memory_space<any>>
    %c1_i32_114 = arith.constant 1 : i32
    %c512_i32_115 = arith.constant 512 : i32
    %142 = tpu.memref_slice %arg8[%c1_i32_114, %c512_i32_115] : memref<2x768xf32, #tpu.memory_space<vmem>> -> memref<1x128xf32, #tpu.memory_space<vmem>>
    %143 = tpu.memref_slice %arg9[%c1_i32_111, %c4_i32_112] : memref<2x6x!tpu.dma_semaphore, #tpu.memory_space<semaphore_mem>> -> memref<1x1x!tpu.dma_semaphore, #tpu.memory_space<semaphore_mem>>
    %144 = tpu.memref_squeeze %143 : memref<1x1x!tpu.dma_semaphore, #tpu.memory_space<semaphore_mem>> -> memref<!tpu.dma_semaphore, #tpu.memory_space<semaphore_mem>>
    tpu.wait_dma2 semaphore(%144 : memref<!tpu.dma_semaphore, #tpu.memory_space<semaphore_mem>>) src(%141 : memref<1x128xf32, #tpu.memory_space<any>>) dst(%142 : memref<1x128xf32, #tpu.memory_space<vmem>>)
    %c1_i32_116 = arith.constant 1 : i32
    %c5_i32_117 = arith.constant 5 : i32
    %c0_i32_118 = arith.constant 0 : i32
    %145 = tpu.memref_slice %arg2[%17, %29, %c0_i32_118] : memref<2x16x128xf32, #tpu.memory_space<any>> -> memref<1x1x128xf32, #tpu.memory_space<any>>
    %146 = tpu.memref_squeeze %145 : memref<1x1x128xf32, #tpu.memory_space<any>> -> memref<1x128xf32, #tpu.memory_space<any>>
    %c1_i32_119 = arith.constant 1 : i32
    %c640_i32_120 = arith.constant 640 : i32
    %147 = tpu.memref_slice %arg8[%c1_i32_119, %c640_i32_120] : memref<2x768xf32, #tpu.memory_space<vmem>> -> memref<1x128xf32, #tpu.memory_space<vmem>>
    %148 = tpu.memref_slice %arg9[%c1_i32_116, %c5_i32_117] : memref<2x6x!tpu.dma_semaphore, #tpu.memory_space<semaphore_mem>> -> memref<1x1x!tpu.dma_semaphore, #tpu.memory_space<semaphore_mem>>
    %149 = tpu.memref_squeeze %148 : memref<1x1x!tpu.dma_semaphore, #tpu.memory_space<semaphore_mem>> -> memref<!tpu.dma_semaphore, #tpu.memory_space<semaphore_mem>>
    tpu.wait_dma2 semaphore(%149 : memref<!tpu.dma_semaphore, #tpu.memory_space<semaphore_mem>>) src(%146 : memref<1x128xf32, #tpu.memory_space<any>>) dst(%147 : memref<1x128xf32, #tpu.memory_space<vmem>>)
    %c0_121 = arith.constant 0 : index
    %c0_122 = arith.constant 0 : index
    %150 = vector.load %arg8[%c0_121, %c0_122] : memref<2x768xf32, #tpu.memory_space<vmem>>, vector<2x768xf32>
    %c0_123 = arith.constant 0 : index
    %c0_124 = arith.constant 0 : index
    %151 = vector.load %arg3[%c0_123, %c0_124] : memref<768x128xf32, #tpu.memory_space<vmem>>, vector<768x128xf32>
    %cst = arith.constant dense<0.000000e+00> : vector<2x128xf32>
    %152 = tpu.matmul %150, %151, %cst {dimension_numbers = #tpu.dot_dimension_numbers<[1], [0], [0], [1], [0, 0, 1, 1], [], []>} : vector<2x768xf32>, vector<768x128xf32>, vector<2x128xf32> -> vector<2x128xf32>
    %c0_125 = arith.constant 0 : index
    %c0_126 = arith.constant 0 : index
    %153 = vector.load %arg4[%c0_125, %c0_126] : memref<1x128xf32, #tpu.memory_space<vmem>>, vector<1x128xf32>
    %154 = vector.broadcast %153 : vector<1x128xf32> to vector<2x128xf32>
    %155 = arith.addf %152, %154 : vector<2x128xf32>
    %156 = math.tanh %155 : vector<2x128xf32>
    %c0_127 = arith.constant 0 : index
    %c0_128 = arith.constant 0 : index
    %157 = vector.load %arg5[%c0_127, %c0_128] : memref<128x128xf32, #tpu.memory_space<vmem>>, vector<128x128xf32>
    %cst_129 = arith.constant dense<0.000000e+00> : vector<2x128xf32>
    %158 = tpu.matmul %156, %157, %cst_129 {dimension_numbers = #tpu.dot_dimension_numbers<[1], [0], [0], [1], [0, 0, 1, 1], [], []>} : vector<2x128xf32>, vector<128x128xf32>, vector<2x128xf32> -> vector<2x128xf32>
    %c0_130 = arith.constant 0 : index
    %c0_131 = arith.constant 0 : index
    %159 = vector.load %arg6[%c0_130, %c0_131] : memref<1x128xf32, #tpu.memory_space<vmem>>, vector<1x128xf32>
    %160 = vector.broadcast %159 : vector<1x128xf32> to vector<2x128xf32>
    %161 = arith.addf %158, %160 : vector<2x128xf32>
    %c0_132 = arith.constant 0 : index
    %c0_133 = arith.constant 0 : index
    %162 = vector.load %arg7[%c0_132, %c0_133] : memref<2x128xf32, #tpu.memory_space<vmem>>, vector<2x128xf32>
    tpu.vector_store %arg7[%c0_132, %c0_133], %161 {strides = array<i32>} : memref<2x128xf32, #tpu.memory_space<vmem>>, vector<2x128xf32>,
    return
  }
  func.func @transform_1(%arg0: i32, %arg1: memref<2x6xi32, #tpu.memory_space<smem>>) -> (i32, i32) {
    %c0_i32 = arith.constant 0 : i32
    %c0_i32_0 = arith.constant 0 : i32
    %c0_i32_1 = arith.constant 0 : i32
    return %c0_i32, %c0_i32_0 : i32, i32
  }
  func.func @transform_2(%arg0: i32, %arg1: memref<2x6xi32, #tpu.memory_space<smem>>) -> (i32, i32) {
    %c0_i32 = arith.constant 0 : i32
    %c0_i32_0 = arith.constant 0 : i32
    %c0_i32_1 = arith.constant 0 : i32
    return %c0_i32, %c0_i32_0 : i32, i32
  }
  func.func @transform_3(%arg0: i32, %arg1: memref<2x6xi32, #tpu.memory_space<smem>>) -> (i32, i32) {
    %c0_i32 = arith.constant 0 : i32
    %c0_i32_0 = arith.constant 0 : i32
    %c0_i32_1 = arith.constant 0 : i32
    return %c0_i32, %c0_i32_0 : i32, i32
  }
  func.func @transform_4(%arg0: i32, %arg1: memref<2x6xi32, #tpu.memory_space<smem>>) -> (i32, i32) {
    %c0_i32 = arith.constant 0 : i32
    %c0_i32_0 = arith.constant 0 : i32
    %c0_i32_1 = arith.constant 0 : i32
    return %c0_i32, %c0_i32_0 : i32, i32
  }
  func.func @transform_5(%arg0: i32, %arg1: memref<2x6xi32, #tpu.memory_space<smem>>) -> (i32, i32) {
    %c0_i32 = arith.constant 0 : i32
    %c0_i32_0 = arith.constant 0 : i32
    return %arg0, %c0_i32 : i32, i32
  }
}

</mosaic_0001>

<bundles_post_ra>
// kernel: tpu_custom_call.1
= control target key start
LH: loop header
LB: loop body
LE: loop exit
PB: predicated region body
PF: predicated region fallthrough
CT: control target
= control target key end

     0   :  { %s1186_s24 = smov [#allocation5]   ;;  %s1392_s0 = inlined_call_operand.hbm [shape: s32[2,6], index: 0, kind: input, shape index: {}]   ;;  %s1393_s1 = inlined_call_operand.hbm [shape: f32[2,16,128], index: 1, kind: input, shape index: {}]   ;;  %s1394_s2 = inlined_call_operand.hbm [shape: f32[768,128], index: 2, kind: input, shape index: {}]   ;;  %s1395_s3 = inlined_call_operand.vmem [shape: f32[1,128], index: 3, kind: input, shape index: {}]   ;;  %s1396_s4 = inlined_call_operand.hbm [shape: f32[128,128], index: 4, kind: input, shape index: {}]   ;;  %s1397_s5 = inlined_call_operand.vmem [shape: f32[1,128], index: 5, kind: input, shape index: {}]   ;;  %s1398_s6 = inlined_call_operand.hbm [shape: f32[2,128], index: 6, kind: output, shape index: {}]  }
   0x1   :  { %s12_s23 = sshll.u32 %s1392_s0, 4  ;;  %s13_s23 = int_to_ptr.hbm [resolvable:$true] %s12_s23 }
   0x2   :  { %15 = dma.hbm_to_smem %s13_s23, 32, %s1186_s24, [#allocation4] }
   0x3   :  { %1154 = dma.done.wait [#allocation4], 32 }
   0x4   :  { %1155 = vsyncadd [#allocation4], 4294967264 }
   0x5   :  { %18 = sfence }
   0x6   :  { %19 = vsyncpa [#allocation7], 0 }
   0x7   :  { %20 = vsyncpa [#allocation10], 0 }
   0x8   :  { %21 = vsyncpa [#allocation8], 0  ;;  %s26_s27 = sshll.u32 %s1394_s2, 4  ;;  %s1187_s28 = smov [#allocation6]   ;;  %s27_s27 = int_to_ptr.hbm [resolvable:$true] %s26_s27 }
   0x9   :  { %s28_s29 = sshll.u32 %s1187_s28, 4  ;;  %s41_s0 = sshll.u32 %s1396_s4, 4  ;;  %s29_s29 = int_to_ptr.vmem [resolvable:$true] %s28_s29  ;;  %s42_s0 = int_to_ptr.hbm [resolvable:$true] %s41_s0 }
   0xa   :  { %s1188_s8 = smov 128   ;;  %s1189_s9 = smov 8  }
   0xb   :  { %34 = dma.hbm_to_vmem [thread:$0]  %s27_s27, 12288, %s29_s29, [#allocation7], %s1188_s8, %s1188_s8, %s1189_s9  }
   0xc   :  { %s1190_s10 = smov [#allocation9]  }
   0xd   :  { %s43_s11 = sshll.u32 %s1190_s10, 4  ;;  %s44_s11 = int_to_ptr.vmem [resolvable:$true] %s43_s11 }
   0xe   :  { %49 = dma.hbm_to_vmem [thread:$0]  %s42_s0, 2048, %s44_s11, [#allocation10], %s1188_s8, %s1188_s8, %s1189_s9  }
   0xf   :  { %1156 = dma.done.wait [#allocation7], 12288  }
  0x10   :  { %1157 = vsyncadd [#allocation7], 4294955008 }
  0x11   :  { %1158 = dma.done.wait [#allocation10], 2048  }
  0x12   :  { %1159 = vsyncadd [#allocation10], 4294965248  ;;  %s64_s2 = sld [smem:[#allocation5]]  ;;  %s1191_s12 = smov [#allocation2]  }
  0x13   :  { %s1248_s13 = sshll.u32 %s1191_s12, 4  ;;  %s737_s14 = sld [smem:[#allocation5 + $0x1]]  ;;  %s103_s13 = int_to_ptr.vmem [resolvable:$true] %s1248_s13 }
  0x14   :  { %s1192_s4 = smov [#allocation2 + $0x2]   ;;  %s1253_s16 = sld [smem:[#allocation5 + $0x2]] }
  0x15   :  { %s1251_s15 = sshll.u32 %s1192_s4, 4  ;;  %s1193_s17 = smov [#allocation2 + $0x4]   ;;  %s120_s15 = int_to_ptr.vmem [resolvable:$true] %s1251_s15 }
  0x16   :  { %s1256_s18 = sshll.u32 %s1193_s17, 4  ;;  %s1258_s19 = sld [smem:[#allocation5 + $0x3]]  ;;  %s137_s18 = int_to_ptr.vmem [resolvable:$true] %s1256_s18 }
  0x17   :  { %s1194_s23 = smov [#allocation2 + $0x6]   ;;  %s1272_s9 = scalar_lea.hbm %s1393_s1, 32 }
  0x18   :  { %s92_s22 = scalar_lea.hbm %s1393_s1, %s64_s2  ;;  %s1264_s24 = sshll.u32 %s1194_s23, 4  ;;  %s154_s24 = int_to_ptr.vmem [resolvable:$true] %s1264_s24 }
  0x19   :  { %s100_s25 = sshll.u32 %s92_s22, 4  ;;  %s107_s28 = scalar_lea.hbm %s1393_s1, %s737_s14  ;;  %s101_s25 = int_to_ptr.hbm [resolvable:$true] %s100_s25 }
  0x1a   :  { %s117_s29 = sshll.u32 %s107_s28, 4  ;;  %s842_s30 = sshra.s32 %s101_s25, 4  ;;  %s843_s30 = int_to_ptr.hbm [resolvable:$true] %s842_s30  ;;  %s118_s29 = int_to_ptr.hbm [resolvable:$true] %s117_s29 }
  0x1b   :  { %s844_s7 = scalar_lea.hbm %s843_s30, 1  ;;  %p847_p1 = scmp.lt.s32.totalorder %s843_s30, %s1393_s1 }
  0x1c   :  { %p845_p0 = scmp.ne.s32.totalorder %s843_s30, %s844_s7  ;;  %p848_p2 = scmp.lt.s32.totalorder %s1272_s9, %s844_s7 }
  0x1e   :  { %p849_p3 = por %p848_p2, %p847_p1 }
  0x20   :  { %p850_p4 = pnand %p849_p3, %p845_p0 }
  0x22   :  { %853 = shalt.err (!%p850_p4)  }
  0x23   :  { %105 = dma.hbm_to_vmem [thread:$0]  %s101_s25, 16, %s103_s13, [#allocation3] }
  0x24   :  { %s124_s14 = scalar_lea.hbm %s1393_s1, %s1253_s16  ;;  %s866_s4 = sshra.s32 %s118_s29, 4  ;;  %s867_s4 = int_to_ptr.hbm [resolvable:$true] %s866_s4 }
  0x25   :  { %s868_s17 = scalar_lea.hbm %s867_s4, 1  ;;  %p871_p6 = scmp.lt.s32.totalorder %s867_s4, %s1393_s1 }
  0x26   :  { %p869_p5 = scmp.ne.s32.totalorder %s867_s4, %s868_s17  ;;  %p872_p7 = scmp.lt.s32.totalorder %s1272_s9, %s868_s17 }
  0x28   :  { %p873_p8 = por %p872_p7, %p871_p6 }
  0x2a   :  { %p874_p9 = pnand %p873_p8, %p869_p5 }
  0x2c   :  { %877 = shalt.err (!%p874_p9)  }
  0x2d   :  { %122 = dma.hbm_to_vmem [thread:$0]  %s118_s29, 16, %s120_s15, [#allocation3 + $0x1] }
  0x2e   :  { %s134_s13 = sshll.u32 %s124_s14, 4  ;;  %s141_s23 = scalar_lea.hbm %s1393_s1, %s1258_s19  ;;  %s135_s13 = int_to_ptr.hbm [resolvable:$true] %s134_s13 }
  0x2f   :  { %s151_s25 = sshll.u32 %s141_s23, 4  ;;  %s890_s26 = sshra.s32 %s135_s13, 4  ;;  %s891_s26 = int_to_ptr.hbm [resolvable:$true] %s890_s26  ;;  %s152_s25 = int_to_ptr.hbm [resolvable:$true] %s151_s25 }
  0x30   :  { %s892_s27 = scalar_lea.hbm %s891_s26, 1  ;;  %p895_p11 = scmp.lt.s32.totalorder %s891_s26, %s1393_s1 }
  0x31   :  { %p893_p10 = scmp.ne.s32.totalorder %s891_s26, %s892_s27  ;;  %p896_p12 = scmp.lt.s32.totalorder %s1272_s9, %s892_s27 }
  0x33   :  { %p897_p13 = por %p896_p12, %p895_p11 }
  0x35   :  { %p898_p0 = pnand %p897_p13, %p893_p10 }
  0x37   :  { %901 = shalt.err (!%p898_p0)  }
  0x38   :  { %139 = dma.hbm_to_vmem [thread:$0]  %s135_s13, 16, %s137_s18, [#allocation3 + $0x2] }
  0x39   :  { %s914_s15 = sshra.s32 %s152_s25, 4  ;;  %s915_s15 = int_to_ptr.hbm [resolvable:$true] %s914_s15 }
  0x3a   :  { %s916_s19 = scalar_lea.hbm %s915_s15, 1  ;;  %p919_p2 = scmp.lt.s32.totalorder %s915_s15, %s1393_s1 }
  0x3b   :  { %p917_p1 = scmp.ne.s32.totalorder %s915_s15, %s916_s19  ;;  %p920_p3 = scmp.lt.s32.totalorder %s1272_s9, %s916_s19 }
  0x3d   :  { %p921_p4 = por %p920_p3, %p919_p2 }
  0x3f   :  { %p922_p5 = pnand %p921_p4, %p917_p1 }
  0x41   :  { %925 = shalt.err (!%p922_p5)  }
  0x42   :  { %156 = dma.hbm_to_vmem [thread:$0]  %s152_s25, 16, %s154_s24, [#allocation3 + $0x3] }
  0x43   :  { %s740_s0 = sld [smem:[#allocation5 + $0x4]]  ;;  %s1195_s8 = smov [#allocation2 + $0x8]  }
  0x44   :  { %s170_s10 = sshll.u32 %s1195_s8, 4  ;;  %s741_s11 = sld [smem:[#allocation5 + $0x5]]  ;;  %s171_s10 = int_to_ptr.vmem [resolvable:$true] %s170_s10 }
  0x45   :  { %s1196_s18 = smov [#allocation2 + $0xa]   ;;  %s1305_s12 = sld [smem:[#allocation5 + $0x80]] }
  0x46   :  { %s1303_s2 = sshll.u32 %s1196_s18, 4  ;;  %s1197_s14 = smov [#allocation2 + $0x1]   ;;  %s188_s2 = int_to_ptr.vmem [resolvable:$true] %s1303_s2 }
  0x47   :  { %s1308_s4 = sshll.u32 %s1197_s14, 4  ;;  %s1310_s17 = sld [smem:[#allocation5 + $0x81]]  ;;  %s206_s4 = int_to_ptr.vmem [resolvable:$true] %s1308_s4 }
  0x49   :  { %s158_s21 = scalar_lea.hbm %s1393_s1, %s740_s0 }
  0x4a   :  { %s168_s13 = sshll.u32 %s158_s21, 4  ;;  %s175_s23 = scalar_lea.hbm %s1393_s1, %s741_s11  ;;  %s169_s13 = int_to_ptr.hbm [resolvable:$true] %s168_s13 }
  0x4b   :  { %s185_s25 = sshll.u32 %s175_s23, 4  ;;  %s938_s26 = sshra.s32 %s169_s13, 4  ;;  %s939_s26 = int_to_ptr.hbm [resolvable:$true] %s938_s26  ;;  %s186_s25 = int_to_ptr.hbm [resolvable:$true] %s185_s25 }
  0x4c   :  { %s940_s27 = scalar_lea.hbm %s939_s26, 1  ;;  %p943_p7 = scmp.lt.s32.totalorder %s939_s26, %s1393_s1 }
  0x4d   :  { %p941_p6 = scmp.ne.s32.totalorder %s939_s26, %s940_s27  ;;  %p944_p8 = scmp.lt.s32.totalorder %s1272_s9, %s940_s27 }
  0x4f   :  { %p945_p9 = por %p944_p8, %p943_p7 }
  0x51   :  { %p946_p10 = pnand %p945_p9, %p941_p6 }
  0x53   :  { %949 = shalt.err (!%p946_p10)  }
  0x54   :  { %173 = dma.hbm_to_vmem [thread:$0]  %s169_s13, 16, %s171_s10, [#allocation3 + $0x4] }
  0x55   :  { %s192_s15 = sadd.s32 16, %s1305_s12  ;;  %s962_s19 = sshra.s32 %s186_s25, 4  ;;  %s963_s19 = int_to_ptr.hbm [resolvable:$true] %s962_s19 }
  0x56   :  { %s964_s29 = scalar_lea.hbm %s963_s19, 1  ;;  %p967_p12 = scmp.lt.s32.totalorder %s963_s19, %s1393_s1 }
  0x57   :  { %p965_p11 = scmp.ne.s32.totalorder %s963_s19, %s964_s29  ;;  %p968_p13 = scmp.lt.s32.totalorder %s1272_s9, %s964_s29 }
  0x59   :  { %p969_p0 = por %p968_p13, %p967_p12 }
  0x5b   :  { %p970_p1 = pnand %p969_p0, %p965_p11 }
  0x5d   :  { %973 = shalt.err (!%p970_p1)  }
  0x5e   :  { %190 = dma.hbm_to_vmem [thread:$0]  %s186_s25, 16, %s188_s2, [#allocation3 + $0x5] }
  0x5f   :  { %s193_s11 = scalar_lea.hbm %s1393_s1, %s192_s15  ;;  %s209_s18 = sadd.s32 16, %s1310_s17 }
  0x60   :  { %s203_s12 = sshll.u32 %s193_s11, 4  ;;  %s210_s20 = scalar_lea.hbm %s1393_s1, %s209_s18  ;;  %s204_s12 = int_to_ptr.hbm [resolvable:$true] %s203_s12 }
  0x61   :  { %s220_s21 = sshll.u32 %s210_s20, 4  ;;  %s986_s13 = sshra.s32 %s204_s12, 4  ;;  %s987_s13 = int_to_ptr.hbm [resolvable:$true] %s986_s13  ;;  %s221_s21 = int_to_ptr.hbm [resolvable:$true] %s220_s21 }
  0x62   :  { %s988_s22 = scalar_lea.hbm %s987_s13, 1  ;;  %p991_p3 = scmp.lt.s32.totalorder %s987_s13, %s1393_s1 }
  0x63   :  { %p989_p2 = scmp.ne.s32.totalorder %s987_s13, %s988_s22  ;;  %p992_p4 = scmp.lt.s32.totalorder %s1272_s9, %s988_s22 }
  0x65   :  { %p993_p5 = por %p992_p4, %p991_p3 }
  0x67   :  { %p994_p6 = pnand %p993_p5, %p989_p2 }
  0x69   :  { %997 = shalt.err (!%p994_p6)  }
  0x6a   :  { %208 = dma.hbm_to_vmem [thread:$0]  %s204_s12, 16, %s206_s4, [#allocation3 + $0x6] }
  0x6b   :  { %s1198_s2 = smov [#allocation2 + $0x3]   ;;  %s744_s25 = sld [smem:[#allocation5 + $0x82]] }
  0x6c   :  { %s222_s17 = sshll.u32 %s1198_s2, 4  ;;  %s1010_s26 = sshra.s32 %s221_s21, 4  ;;  %s223_s17 = int_to_ptr.vmem [resolvable:$true] %s222_s17  ;;  %s1011_s26 = int_to_ptr.hbm [resolvable:$true] %s1010_s26 }
  0x6d   :  { %s1012_s27 = scalar_lea.hbm %s1011_s26, 1  ;;  %p1015_p8 = scmp.lt.s32.totalorder %s1011_s26, %s1393_s1 }
  0x6e   :  { %p1013_p7 = scmp.ne.s32.totalorder %s1011_s26, %s1012_s27  ;;  %p1016_p9 = scmp.lt.s32.totalorder %s1272_s9, %s1012_s27 }
  0x70   :  { %p1017_p10 = por %p1016_p9, %p1015_p8 }
  0x72   :  { %p1018_p11 = pnand %p1017_p10, %p1013_p7 }
  0x74   :  { %1021 = shalt.err (!%p1018_p11)  }
  0x75   :  { %225 = dma.hbm_to_vmem [thread:$0]  %s221_s21, 16, %s223_s17, [#allocation3 + $0x7] }
  0x76   :  { %s1199_s15 = smov [#allocation2 + $0x5]   ;;  %s745_s19 = sld [smem:[#allocation5 + $0x83]] }
  0x77   :  { %s239_s4 = sshll.u32 %s1199_s15, 4  ;;  %s1200_s29 = smov [#allocation2 + $0x7]   ;;  %s240_s4 = int_to_ptr.vmem [resolvable:$true] %s239_s4 }
  0x78   :  { %s1347_s7 = sshll.u32 %s1200_s29, 4  ;;  %s746_s0 = sld [smem:[#allocation5 + $0x84]]  ;;  %s257_s7 = int_to_ptr.vmem [resolvable:$true] %s1347_s7 }
  0x79   :  { %s226_s8 = sadd.s32 16, %s744_s25  ;;  %s1201_s14 = smov [#allocation2 + $0x9]  }
  0x7a   :  { %s227_s18 = scalar_lea.hbm %s1393_s1, %s226_s8  ;;  %s1353_s24 = sshll.u32 %s1201_s14, 4  ;;  %s274_s24 = int_to_ptr.vmem [resolvable:$true] %s1353_s24 }
  0x7b   :  { %s237_s12 = sshll.u32 %s227_s18, 4  ;;  %s238_s12 = int_to_ptr.hbm [resolvable:$true] %s237_s12 }
  0x7c   :  { %s243_s20 = sadd.s32 16, %s745_s19  ;;  %s1034_s21 = sshra.s32 %s238_s12, 4  ;;  %s1035_s21 = int_to_ptr.hbm [resolvable:$true] %s1034_s21 }
  0x7d   :  { %s1036_s13 = scalar_lea.hbm %s1035_s21, 1  ;;  %p1039_p13 = scmp.lt.s32.totalorder %s1035_s21, %s1393_s1 }
  0x7e   :  { %p1037_p12 = scmp.ne.s32.totalorder %s1035_s21, %s1036_s13  ;;  %p1040_p0 = scmp.lt.s32.totalorder %s1272_s9, %s1036_s13 }
  0x80   :  { %p1041_p1 = por %p1040_p0, %p1039_p13 }
  0x82   :  { %p1042_p2 = pnand %p1041_p1, %p1037_p12 }
  0x84   :  { %1045 = shalt.err (!%p1042_p2)  }
  0x85   :  { %242 = dma.hbm_to_vmem [thread:$0]  %s238_s12, 16, %s240_s4, [#allocation3 + $0x8] }
  0x86   :  { %s244_s17 = scalar_lea.hbm %s1393_s1, %s243_s20  ;;  %s260_s25 = sadd.s32 16, %s746_s0 }
  0x87   :  { %s254_s26 = sshll.u32 %s244_s17, 4  ;;  %s261_s30 = scalar_lea.hbm %s1393_s1, %s260_s25  ;;  %s255_s26 = int_to_ptr.hbm [resolvable:$true] %s254_s26 }
  0x88   :  { %s271_s15 = sshll.u32 %s261_s30, 4  ;;  %s1058_s19 = sshra.s32 %s255_s26, 4  ;;  %s1059_s19 = int_to_ptr.hbm [resolvable:$true] %s1058_s19  ;;  %s272_s15 = int_to_ptr.hbm [resolvable:$true] %s271_s15 }
  0x89   :  { %s1060_s29 = scalar_lea.hbm %s1059_s19, 1  ;;  %p1063_p4 = scmp.lt.s32.totalorder %s1059_s19, %s1393_s1 }
  0x8a   :  { %p1061_p3 = scmp.ne.s32.totalorder %s1059_s19, %s1060_s29  ;;  %p1064_p5 = scmp.lt.s32.totalorder %s1272_s9, %s1060_s29 }
  0x8c   :  { %p1065_p6 = por %p1064_p5, %p1063_p4 }
  0x8e   :  { %p1066_p7 = pnand %p1065_p6, %p1061_p3 }
  0x90   :  { %1069 = shalt.err (!%p1066_p7)  }
  0x91   :  { %259 = dma.hbm_to_vmem [thread:$0]  %s255_s26, 16, %s257_s7, [#allocation3 + $0x9] }
  0x92   :  { %s1082_s4 = sshra.s32 %s272_s15, 4  ;;  %s1083_s4 = int_to_ptr.hbm [resolvable:$true] %s1082_s4 }
  0x93   :  { %s1084_s0 = scalar_lea.hbm %s1083_s4, 1  ;;  %p1087_p9 = scmp.lt.s32.totalorder %s1083_s4, %s1393_s1 }
  0x94   :  { %p1085_p8 = scmp.ne.s32.totalorder %s1083_s4, %s1084_s0  ;;  %p1088_p10 = scmp.lt.s32.totalorder %s1272_s9, %s1084_s0 }
  0x96   :  { %p1089_p11 = por %p1088_p10, %p1087_p9 }
  0x98   :  { %p1090_p12 = pnand %p1089_p11, %p1085_p8 }
  0x9a   :  { %1093 = shalt.err (!%p1090_p12)  }
  0x9b   :  { %276 = dma.hbm_to_vmem [thread:$0]  %s272_s15, 16, %s274_s24, [#allocation3 + $0xa] }
  0x9c   :  { %s747_s12 = sld [smem:[#allocation5 + $0x85]]  ;;  %s1202_s14 = smov [#allocation2 + $0xb]  }
  0x9d   :  { %s290_s20 = sshll.u32 %s1202_s14, 4  ;;  %s291_s20 = int_to_ptr.vmem [resolvable:$true] %s290_s20 }
  0xa2   :  { %s277_s7 = sadd.s32 16, %s747_s12 }
  0xa3   :  { %s278_s22 = scalar_lea.hbm %s1393_s1, %s277_s7 }
  0xa4   :  { %s288_s16 = sshll.u32 %s278_s22, 4  ;;  %s289_s16 = int_to_ptr.hbm [resolvable:$true] %s288_s16 }
  0xa5   :  { %s1106_s23 = sshra.s32 %s289_s16, 4  ;;  %s1107_s23 = int_to_ptr.hbm [resolvable:$true] %s1106_s23 }
  0xa6   :  { %s1108_s2 = scalar_lea.hbm %s1107_s23, 1  ;;  %p1111_p0 = scmp.lt.s32.totalorder %s1107_s23, %s1393_s1 }
  0xa7   :  { %p1109_p13 = scmp.ne.s32.totalorder %s1107_s23, %s1108_s2  ;;  %p1112_p1 = scmp.lt.s32.totalorder %s1272_s9, %s1108_s2 }
  0xa9   :  { %p1113_p2 = por %p1112_p1, %p1111_p0 }
  0xab   :  { %p1114_p3 = pnand %p1113_p2, %p1109_p13 }
  0xad   :  { %1117 = shalt.err (!%p1114_p3)  }
  0xae   :  { %293 = dma.hbm_to_vmem [thread:$0]  %s289_s16, 16, %s291_s20, [#allocation3 + $0xb] }
  0xaf   :  { %1160 = dma.done.wait [#allocation3], 16 }
  0xb0   :  { %1161 = vsyncadd [#allocation3], 4294967280 }
  0xb1   :  { %1162 = dma.done.wait [#allocation3 + $0x1], 16 }
  0xb2   :  { %1163 = vsyncadd [#allocation3 + $0x1], 4294967280 }
  0xb3   :  { %1164 = dma.done.wait [#allocation3 + $0x2], 16 }
  0xb4   :  { %1165 = vsyncadd [#allocation3 + $0x2], 4294967280 }
  0xb5   :  { %1166 = dma.done.wait [#allocation3 + $0x3], 16 }
  0xb6   :  { %1167 = vsyncadd [#allocation3 + $0x3], 4294967280 }
  0xb7   :  { %1168 = dma.done.wait [#allocation3 + $0x4], 16 }
  0xb8   :  { %1169 = vsyncadd [#allocation3 + $0x4], 4294967280 }
  0xb9   :  { %1170 = dma.done.wait [#allocation3 + $0x5], 16 }
  0xba   :  { %1171 = vsyncadd [#allocation3 + $0x5], 4294967280 }
  0xbb   :  { %1172 = dma.done.wait [#allocation3 + $0x6], 16 }
  0xbc   :  { %1173 = vsyncadd [#allocation3 + $0x6], 4294967280 }
  0xbd   :  { %1174 = dma.done.wait [#allocation3 + $0x7], 16 }
  0xbe   :  { %1175 = vsyncadd [#allocation3 + $0x7], 4294967280 }
  0xbf   :  { %1176 = dma.done.wait [#allocation3 + $0x8], 16 }
  0xc0   :  { %1177 = vsyncadd [#allocation3 + $0x8], 4294967280 }
  0xc1   :  { %1178 = dma.done.wait [#allocation3 + $0x9], 16 }
  0xc2   :  { %1179 = vsyncadd [#allocation3 + $0x9], 4294967280 }
  0xc3   :  { %1180 = dma.done.wait [#allocation3 + $0xa], 16 }
  0xc4   :  { %1181 = vsyncadd [#allocation3 + $0xa], 4294967280 }
  0xc5   :  { %1182 = dma.done.wait [#allocation3 + $0xb], 16 }
  0xc6   :  { %1183 = vsyncadd [#allocation3 + $0xb], 4294967280  ;;  %v336_v0 = vld [vmem:[#allocation6 + $0x78] sm:$0xff]  ;;  %v335_v1 = vld [vmem:[#allocation6 + $0x70] sm:$0xff]  ;;  %s607_s15 = sshll.u32 %s1398_s6, 4  ;;  %s608_s15 = int_to_ptr.hbm [resolvable:$true] %s607_s15 }
  0xc7   :  { %v352_v2 = vld [vmem:[#allocation6 + $0xf8] sm:$0xff]  ;;  %438 = vmatpush.msra.mxu0 %v336_v0  ;;  %v351_v3 = vld [vmem:[#allocation6 + $0xf0] sm:$0xff]  ;;  %v334_v4 = vld [vmem:[#allocation6 + $0x68] sm:$0xff] }
  0xc8   :  { %458 = vmatpush.msra.mxu1 %v352_v2  ;;  %v350_v5 = vld [vmem:[#allocation6 + $0xe8] sm:$0xff]  ;;  %v333_v6 = vld [vmem:[#allocation6 + $0x60] sm:$0xff]  ;;  %v332_v8 = vld [vmem:[#allocation6 + $0x58] sm:$0xff] }
  0xc9   :  { %439 = vmatpush.msra.mxu0 %v335_v1  ;;  %v349_v7 = vld [vmem:[#allocation6 + $0xe0] sm:$0xff]  ;;  %v348_v9 = vld [vmem:[#allocation6 + $0xd8] sm:$0xff]  ;;  %v331_v10 = vld [vmem:[#allocation6 + $0x50] sm:$0xff] }
  0xca   :  { %459 = vmatpush.msra.mxu1 %v351_v3  ;;  %v368_v11 = vld [vmem:[#allocation6 + $0x178] sm:$0xff]  ;;  %v347_v12 = vld [vmem:[#allocation6 + $0xd0] sm:$0xff]  ;;  %v366_v15 = vld [vmem:[#allocation6 + $0x168] sm:$0xff] }
  0xcb   :  { %440 = vmatpush.msra.mxu0 %v334_v4  ;;  %478 = vmatpush.msra.mxu2 %v368_v11  ;;  %v367_v13 = vld [vmem:[#allocation6 + $0x170] sm:$0xff]  ;;  %v384_v14 = vld [vmem:[#allocation6 + $0x1f8] sm:$0xff]  ;;  %v330_v17 = vld [vmem:[#allocation6 + $0x48] sm:$0xff] }
  0xcc   :  { %460 = vmatpush.msra.mxu1 %v350_v5  ;;  %v383_v16 = vld [vmem:[#allocation6 + $0x1f0] sm:$0xff]  ;;  %v346_v18 = vld [vmem:[#allocation6 + $0xc8] sm:$0xff]  ;;  %498 = vmatpush.msra.mxu3 %v384_v14  ;;  %v365_v19 = vld [vmem:[#allocation6 + $0x160] sm:$0xff] }
  0xcd   :  { %441 = vmatpush.msra.mxu0 %v333_v6  ;;  %479 = vmatpush.msra.mxu2 %v367_v13  ;;  %v382_v20 = vld [vmem:[#allocation6 + $0x1e8] sm:$0xff]  ;;  %v329_v21 = vld [vmem:[#allocation6 + $0x40] sm:$0xff]  ;;  %v364_v23 = vld [vmem:[#allocation6 + $0x158] sm:$0xff] }
  0xce   :  { %461 = vmatpush.msra.mxu1 %v349_v7  ;;  %v345_v22 = vld [vmem:[#allocation6 + $0xc0] sm:$0xff]  ;;  %499 = vmatpush.msra.mxu3 %v383_v16  ;;  %v328_v25 = vld [vmem:[#allocation6 + $0x38] sm:$0xff]  ;;  %v363_v27 = vld [vmem:[#allocation6 + $0x150] sm:$0xff] }
  0xcf   :  { %442 = vmatpush.msra.mxu0 %v332_v8  ;;  %480 = vmatpush.msra.mxu2 %v366_v15  ;;  %v381_v24 = vld [vmem:[#allocation6 + $0x1e0] sm:$0xff]  ;;  %v344_v26 = vld [vmem:[#allocation6 + $0xb8] sm:$0xff]  ;;  %v327_v29 = vld [vmem:[#allocation6 + $0x30] sm:$0xff] }
  0xd0   :  { %462 = vmatpush.msra.mxu1 %v348_v9  ;;  %500 = vmatpush.msra.mxu3 %v382_v20  ;;  %v380_v28 = vld [vmem:[#allocation6 + $0x1d8] sm:$0xff]  ;;  %v343_v30 = vld [vmem:[#allocation6 + $0xb0] sm:$0xff]  ;;  %v362_v31 = vld [vmem:[#allocation6 + $0x148] sm:$0xff] }
  0xd1   :  { %443 = vmatpush.msra.mxu0 %v331_v10  ;;  %481 = vmatpush.msra.mxu2 %v365_v19  ;;  %v379_v32 = vld [vmem:[#allocation6 + $0x1d0] sm:$0xff]  ;;  %v326_v33 = vld [vmem:[#allocation6 + $0x28] sm:$0xff]  ;;  %v361_v35 = vld [vmem:[#allocation6 + $0x140] sm:$0xff] }
  0xd2   :  { %463 = vmatpush.msra.mxu1 %v347_v12  ;;  %501 = vmatpush.msra.mxu3 %v381_v24  ;;  %v342_v34 = vld [vmem:[#allocation6 + $0xa8] sm:$0xff]  ;;  %v325_v37 = vld [vmem:[#allocation6 + $0x20] sm:$0xff]  ;;  %v360_v39 = vld [vmem:[#allocation6 + $0x138] sm:$0xff] }
  0xd3   :  { %444 = vmatpush.msra.mxu0 %v330_v17  ;;  %482 = vmatpush.msra.mxu2 %v364_v23  ;;  %v378_v36 = vld [vmem:[#allocation6 + $0x1c8] sm:$0xff]  ;;  %v341_v38 = vld [vmem:[#allocation6 + $0xa0] sm:$0xff]  ;;  %v324_v41 = vld [vmem:[#allocation6 + $0x18] sm:$0xff] }
  0xd4   :  { %464 = vmatpush.msra.mxu1 %v346_v18  ;;  %502 = vmatpush.msra.mxu3 %v380_v28  ;;  %v377_v40 = vld [vmem:[#allocation6 + $0x1c0] sm:$0xff]  ;;  %v340_v42 = vld [vmem:[#allocation6 + $0x98] sm:$0xff]  ;;  %v359_v43 = vld [vmem:[#allocation6 + $0x130] sm:$0xff] }
  0xd5   :  { %445 = vmatpush.msra.mxu0 %v329_v21  ;;  %483 = vmatpush.msra.mxu2 %v363_v27  ;;  %v376_v44 = vld [vmem:[#allocation6 + $0x1b8] sm:$0xff]  ;;  %v323_v45 = vld [vmem:[#allocation6 + $0x10] sm:$0xff]  ;;  %v358_v47 = vld [vmem:[#allocation6 + $0x128] sm:$0xff] }
  0xd6   :  { %465 = vmatpush.msra.mxu1 %v345_v22  ;;  %503 = vmatpush.msra.mxu3 %v379_v32  ;;  %v339_v46 = vld [vmem:[#allocation6 + $0x90] sm:$0xff]  ;;  %v322_v49 = vld [vmem:[#allocation6 + $0x8] sm:$0xff]  ;;  %v357_v51 = vld [vmem:[#allocation6 + $0x120] sm:$0xff] }
  0xd7   :  { %446 = vmatpush.msra.mxu0 %v328_v25  ;;  %484 = vmatpush.msra.mxu2 %v362_v31  ;;  %v375_v48 = vld [vmem:[#allocation6 + $0x1b0] sm:$0xff]  ;;  %v338_v50 = vld [vmem:[#allocation6 + $0x88] sm:$0xff]  ;;  %v321_v53 = vld [vmem:[#allocation6] sm:$0xff] }
  0xd8   :  { %466 = vmatpush.msra.mxu1 %v344_v26  ;;  %504 = vmatpush.msra.mxu3 %v378_v36  ;;  %v374_v52 = vld [vmem:[#allocation6 + $0x1a8] sm:$0xff]  ;;  %v337_v54 = vld [vmem:[#allocation6 + $0x80] sm:$0xff]  ;;  %v319_v55 = vld [vmem:[#allocation2] sm:$0xff] }
  0xd9   :  { %447 = vmatpush.msra.mxu0 %v327_v29  ;;  %485 = vmatpush.msra.mxu2 %v361_v35  ;;  %v400_v56 = vld [vmem:[#allocation6 + $0x278] sm:$0xff]  ;;  %423 = vst [vmem:[#allocation1] ss:$4 sm:$0xff] %v319_v55  ;;  %v373_v59 = vld [vmem:[#allocation6 + $0x1a0] sm:$0xff]  ;;  %v399_v60 = vld [vmem:[#allocation6 + $0x270] sm:$0xff] }
  0xda   :  { %467 = vmatpush.msra.mxu1 %v343_v30  ;;  %505 = vmatpush.msra.mxu3 %v377_v40  ;;  %v416_v57 = vld [vmem:[#allocation6 + $0x2f8] sm:$0xff]  ;;  %v415_v61 = vld [vmem:[#allocation6 + $0x2f0] sm:$0xff]  ;;  %v398_v1 = vld [vmem:[#allocation6 + $0x268] sm:$0xff] }
  0xdb   :  { %448 = vmatpush.msra.mxu0 %v326_v33  ;;  %486 = vmatpush.msra.mxu2 %v360_v39  ;;  %v356_v58 = vld [vmem:[#allocation6 + $0x118] sm:$0xff]  ;;  %v355_v62 = vld [vmem:[#allocation6 + $0x110] sm:$0xff]  ;;  %v414_v2 = vld [vmem:[#allocation6 + $0x2e8] sm:$0xff] }
  0xdc   :  { %468 = vmatpush.msra.mxu1 %v342_v34  ;;  %506 = vmatpush.msra.mxu3 %v376_v44  ;;  %v372_v63 = vld [vmem:[#allocation6 + $0x198] sm:$0xff]  ;;  %v354_v3 = vld [vmem:[#allocation6 + $0x108] sm:$0xff]  ;;  %v371_v4 = vld [vmem:[#allocation6 + $0x190] sm:$0xff] }
  0xdd   :  { %449 = vmatpush.msra.mxu0 %v325_v37  ;;  %487 = vmatpush.msra.mxu2 %v359_v43  ;;  %v320_v0 = vld [vmem:[#allocation2 + $0x8] sm:$0xf]  ;;  %v397_v5 = vld [vmem:[#allocation6 + $0x260] sm:$0xff]  ;;  %v370_v8 = vld [vmem:[#allocation6 + $0x188] sm:$0xff] }
  0xde   :  { %469 = vmatpush.msra.mxu1 %v341_v38  ;;  %507 = vmatpush.msra.mxu3 %v375_v48  ;;  %425 = vst [vmem:[#allocation1 + $0x20] ss:$4 sm:$0xff] %v320_v0  ;;  %v413_v6 = vld [vmem:[#allocation6 + $0x2e0] sm:$0xff]  ;;  %v396_v9 = vld [vmem:[#allocation6 + $0x258] sm:$0xff]  ;;  %v395_v13 = vld [vmem:[#allocation6 + $0x250] sm:$0xff] }
  0xdf   :  { %450 = vmatpush.msra.mxu0 %v324_v41  ;;  %488 = vmatpush.msra.mxu2 %v358_v47  ;;  %v353_v7 = vld [vmem:[#allocation6 + $0x100] sm:$0xff]  ;;  %v412_v10 = vld [vmem:[#allocation6 + $0x2d8] sm:$0xff]  ;;  %v411_v14 = vld [vmem:[#allocation6 + $0x2d0] sm:$0xff] }
  0xe0   :  { %470 = vmatpush.msra.mxu1 %v340_v42  ;;  %508 = vmatpush.msra.mxu3 %v374_v52  ;;  %v428_v11 = vld.sshfl [vmem:[#allocation1 + $0x10] sm:$0xff pattern:$0x73625140]  ;;  %v426_v15 = vld.sshfl [vmem:[#allocation1] sm:$0xff pattern:$0x73625140] }
  0xe1   :  { %451 = vmatpush.msra.mxu0 %v323_v45  ;;  %489 = vmatpush.msra.mxu2 %v357_v51  ;;  %v369_v12 = vld [vmem:[#allocation6 + $0x180] sm:$0xff]  ;;  %v394_v17 = vld [vmem:[#allocation6 + $0x248] sm:$0xff]  ;;  %v427_v19 = vld.sshfl [vmem:[#allocation1 + $0x8] sm:$0xff pattern:$0x73625140] }
  0xe2   :  { %471 = vmatpush.msra.mxu1 %v339_v46  ;;  %509 = vmatpush.msra.mxu3 %v373_v59  ;;  %v429_v16 = vld.sshfl [vmem:[#allocation1 + $0x18] sm:$0xff pattern:$0x73625140]  ;;  %v574_v20 = vld [vmem:[#allocation9 + $0x78] sm:$0xff]  ;;  %v573_v23 = vld [vmem:[#allocation9 + $0x70] sm:$0xff] }
  0xe3   :  { %452 = vmatpush.msra.mxu0 %v322_v49  ;;  %490 = vmatpush.msra.mxu2 %v356_v58  ;;  %v410_v18 = vld [vmem:[#allocation6 + $0x2c8] sm:$0xff]  ;;  %v393_v21 = vld [vmem:[#allocation6 + $0x240] sm:$0xff]  ;;  %v392_v24 = vld [vmem:[#allocation6 + $0x238] sm:$0xff] }
  0xe4   :  { %472 = vmatpush.msra.mxu1 %v338_v50  ;;  %510 = vmatpush.msra.mxu3 %v372_v63  ;;  %v409_v22 = vld [vmem:[#allocation6 + $0x2c0] sm:$0xff]  ;;  %v408_v25 = vld [vmem:[#allocation6 + $0x2b8] sm:$0xff]  ;;  %v572_v26 = vld [vmem:[#allocation9 + $0x68] sm:$0xff] }
  0xe5   :  { %453 = vmatpush.msra.mxu0 %v321_v53  ;;  %491 = vmatpush.msra.mxu2 %v355_v62  ;;  %v391_v27 = vld [vmem:[#allocation6 + $0x230] sm:$0xff]  ;;  %v571_v29 = vld [vmem:[#allocation9 + $0x60] sm:$0xff]  ;;  %v390_v30 = vld [vmem:[#allocation6 + $0x228] sm:$0xff] }
  0xe6   :  { %473 = vmatpush.msra.mxu1 %v337_v54  ;;  %511 = vmatpush.msra.mxu3 %v371_v4  ;;  %v407_v28 = vld [vmem:[#allocation6 + $0x2b0] sm:$0xff]  ;;  %v406_v31 = vld [vmem:[#allocation6 + $0x2a8] sm:$0xff]  ;;  %v570_v32 = vld [vmem:[#allocation9 + $0x58] sm:$0xff] }
  0xe7   :  { %518 = vmatpush.msrb.mxu0 %v400_v56  ;;  %492 = vmatpush.msra.mxu2 %v354_v3  ;;  %v389_v33 = vld [vmem:[#allocation6 + $0x220] sm:$0xff]  ;;  %v569_v35 = vld [vmem:[#allocation9 + $0x50] sm:$0xff]  ;;  %v388_v36 = vld [vmem:[#allocation6 + $0x218] sm:$0xff] }
  0xe8   :  { %538 = vmatpush.msrb.mxu1 %v416_v57  ;;  %512 = vmatpush.msra.mxu3 %v370_v8  ;;  %v405_v34 = vld [vmem:[#allocation6 + $0x2a0] sm:$0xff]  ;;  %v404_v37 = vld [vmem:[#allocation6 + $0x298] sm:$0xff]  ;;  %v387_v38 = vld [vmem:[#allocation6 + $0x210] sm:$0xff] }
  0xe9   :  { %519 = vmatpush.msrb.mxu0 %v399_v60  ;;  %493 = vmatpush.msra.mxu2 %v353_v7  ;;  %v403_v39 = vld [vmem:[#allocation6 + $0x290] sm:$0xff]  ;;  %v386_v40 = vld [vmem:[#allocation6 + $0x208] sm:$0xff]  ;;  %v385_v42 = vld [vmem:[#allocation6 + $0x200] sm:$0xff] }
  0xea   :  { %539 = vmatpush.msrb.mxu1 %v415_v61  ;;  %494 = vmatmul.f32.vlgmr.msra.gmra.mxu2 %v428_v11  ;;  %v402_v41 = vld [vmem:[#allocation6 + $0x288] sm:$0xff]  ;;  %v401_v43 = vld [vmem:[#allocation6 + $0x280] sm:$0xff]  ;;  %v431_v45 = vld.sshfl [vmem:[#allocation1 + $0x28] sm:$0xff pattern:$0x73625140] }
  0xeb   :  { %520 = vmatpush.msrb.mxu0 %v398_v1  ;;  %513 = vmatpush.msra.mxu3 %v369_v12  ;;  %v430_v44 = vld.sshfl [vmem:[#allocation1 + $0x20] sm:$0xff pattern:$0x73625140]  ;;  %v567_v47 = vld [vmem:[#allocation9 + $0x40] sm:$0xff]  ;;  %v566_v48 = vld [vmem:[#allocation9 + $0x38] sm:$0xff] }
  0xec   :  { %540 = vmatpush.msrb.mxu1 %v414_v2  ;;  %454 = vmatmul.f32.vlgmr.msra.gmra.mxu0 %v426_v15  ;;  %v568_v46 = vld [vmem:[#allocation9 + $0x48] sm:$0xff]  ;;  %v565_v49 = vld [vmem:[#allocation9 + $0x30] sm:$0xff]  ;;  %v563_v51 = vld [vmem:[#allocation9 + $0x20] sm:$0xff] }
  0xed   :  { %521 = vmatpush.msrb.mxu0 %v397_v5  ;;  %514 = vmatmul.f32.vlgmr.msra.gmra.mxu3 %v429_v16  ;;  %v564_v50 = vld [vmem:[#allocation9 + $0x28] sm:$0xff]  ;;  %v562_v52 = vld [vmem:[#allocation9 + $0x18] sm:$0xff]  ;;  %v561_v53 = vld [vmem:[#allocation9 + $0x10] sm:$0xff] }
  0xee   :  { %541 = vmatpush.msrb.mxu1 %v413_v6  ;;  %579 = vmatpush.msrb.mxu2 %v574_v20  ;;  %v560_v54 = vld [vmem:[#allocation9 + $0x8] sm:$0xff]  ;;  %v559_v55 = vld [vmem:[#allocation9] sm:$0xff] }
  0xef   :  { %522 = vmatpush.msrb.mxu0 %v396_v9  ;;  %474 = vmatmul.f32.vlgmr.msra.gmra.mxu1 %v427_v19  ;;  %v778_v56 = vld [vmem:[%s1395_s3] ss:$0 sm:$0xff]  ;;  %s1203_s3 = smov [#allocation11]  }
  0xf0   :  { %542 = vmatpush.msrb.mxu1 %v412_v10  ;;  %580 = vmatpush.msrb.mxu2 %v573_v23  ;;  %v779_v6 = vld [vmem:[%s1397_s5] ss:$0 sm:$0xff]  ;;  %s605_s27 = sshll.u32 %s1203_s3, 4  ;;  %s606_s27 = int_to_ptr.vmem [resolvable:$true] %s605_s27 }
  0xf1   :  { %523 = vmatpush.msrb.mxu0 %v395_v13 }
  0xf2   :  { %543 = vmatpush.msrb.mxu1 %v411_v14  ;;  %581 = vmatpush.msrb.mxu2 %v572_v26 }
  0xf3   :  { %524 = vmatpush.msrb.mxu0 %v394_v17 }
  0xf4   :  { %544 = vmatpush.msrb.mxu1 %v410_v18  ;;  %582 = vmatpush.msrb.mxu2 %v571_v29 }
  0xf5   :  { %525 = vmatpush.msrb.mxu0 %v393_v21 }
  0xf6   :  { %545 = vmatpush.msrb.mxu1 %v409_v22  ;;  %583 = vmatpush.msrb.mxu2 %v570_v32 }
  0xf7   :  { %526 = vmatpush.msrb.mxu0 %v392_v24 }
  0xf8   :  { %546 = vmatpush.msrb.mxu1 %v408_v25  ;;  %584 = vmatpush.msrb.mxu2 %v569_v35 }
  0xf9   :  { %527 = vmatpush.msrb.mxu0 %v391_v27 }
  0xfa   :  { %547 = vmatpush.msrb.mxu1 %v407_v28  ;;  %585 = vmatpush.msrb.mxu2 %v568_v46 }
  0xfb   :  { %528 = vmatpush.msrb.mxu0 %v390_v30 }
  0xfc   :  { %548 = vmatpush.msrb.mxu1 %v406_v31  ;;  %586 = vmatpush.msrb.mxu2 %v567_v47 }
  0xfd   :  { %529 = vmatpush.msrb.mxu0 %v389_v33 }
  0xfe   :  { %549 = vmatpush.msrb.mxu1 %v405_v34  ;;  %587 = vmatpush.msrb.mxu2 %v566_v48 }
  0xff   :  { %530 = vmatpush.msrb.mxu0 %v388_v36 }
 0x100   :  { %550 = vmatpush.msrb.mxu1 %v404_v37  ;;  %588 = vmatpush.msrb.mxu2 %v565_v49 }
 0x101   :  { %531 = vmatpush.msrb.mxu0 %v387_v38 }
 0x102   :  { %551 = vmatpush.msrb.mxu1 %v403_v39  ;;  %589 = vmatpush.msrb.mxu2 %v564_v50 }
 0x103   :  { %532 = vmatpush.msrb.mxu0 %v386_v40 }
 0x104   :  { %552 = vmatpush.msrb.mxu1 %v402_v41  ;;  %590 = vmatpush.msrb.mxu2 %v563_v51 }
 0x105   :  { %533 = vmatpush.msrb.mxu0 %v385_v42 }
 0x106   :  { %553 = vmatpush.msrb.mxu1 %v401_v43  ;;  %534 = vmatmul.f32.vlgmr.msrb.gmra.mxu0 %v430_v44 }
 0x107   :  { %554 = vmatmul.f32.vlgmr.msrb.gmra.mxu1 %v431_v45  ;;  %591 = vmatpush.msrb.mxu2 %v562_v52 }
 0x109   :  { %592 = vmatpush.msrb.mxu2 %v561_v53 }
 0x10b   :  { %593 = vmatpush.msrb.mxu2 %v560_v54 }
 0x10d   :  { %594 = vmatpush.msrb.mxu2 %v559_v55 }
 0x169   :  { %v455_v57 = vpop.f32.mrf.mxu0 }
 0x16a   :  { %v456_v58 = vadd.f32 %v778_v56, %v455_v57 }
 0x16c   :  { %v475_v59 = vpop.f32.mrf.mxu1 }
 0x16d   :  { %v476_v60 = vadd.f32 %v475_v59, %v456_v58  ;;  %v495_v61 = vpop.f32.mrf.mxu2 }
 0x16f   :  { %v496_v62 = vadd.f32 %v495_v61, %v476_v60 }
 0x170   :  { %v515_v63 = vpop.f32.mrf.mxu3 }
 0x171   :  { %v516_v0 = vadd.f32 %v515_v63, %v496_v62 }
 0x183   :  { %v535_v1 = vpop.f32.mrf.mxu0 }
 0x184   :  { %v555_v2 = vpop.f32.mrf.mxu1  ;;  %v536_v3 = vadd.f32 %v535_v1, %v516_v0 }
 0x186   :  { %v556_v4 = vadd.f32 %v555_v2, %v536_v3 }
 0x188   :  { %780 = vtanh.f32 %v556_v4 }
 0x18e   :  { %v781_v5 = vpop.eup %780 }
 0x18f   :  { %595 = vmatmul.f32.vlgmr.msrb.gmra.mxu2 %v781_v5 }
 0x212   :  { %v596_v7 = vpop.f32.mrf.mxu2 }
 0x213   :  { %v597_v8 = vadd.f32 %v779_v6, %v596_v7 }
 0x215   :  { %599 = vst [vmem:[#allocation11] sm:$0x3] %v597_v8 }
 0x216   :  { %610 = dma.vmem_to_hbm [thread:$0]  %s606_s27, 32, %s608_s15, [#allocation8]  }
 0x217   :  { %1184 = dma.done.wait [#allocation8], 32  }
 0x218   :  { %1185 = vsyncadd [#allocation8], 4294967264 }
 0x219   :  { %615 = vsyncpa [#allocation7], 1 }
 0x21a   :  { %616 = vsyncpa [#allocation10], 1 }
 0x21b   :  { %617 = vsyncpa [#allocation8], 1 }
 0x21c   :  { %618 = vsyncmov [#allocation3] }
 0x21f   :  { %s619_s19 = vpop.sfrf %618 }
 0x220   :  { %p748_p4 = scmp.ne.s32.totalorder %s619_s19, 0 }
 0x222   :  { %623 = shalt.err (%p748_p4)  }
 0x223   :  { %625 = vsyncmov [#allocation3 + $0x1] }
 0x226   :  { %s626_s5 = vpop.sfrf %625 }
 0x227   :  { %p749_p5 = scmp.ne.s32.totalorder %s626_s5, 0 }
 0x229   :  { %630 = shalt.err (%p749_p5)  }
 0x22a   :  { %632 = vsyncmov [#allocation3 + $0x2] }
 0x22d   :  { %s633_s6 = vpop.sfrf %632 }
 0x22e   :  { %p750_p6 = scmp.ne.s32.totalorder %s633_s6, 0 }
 0x230   :  { %637 = shalt.err (%p750_p6)  }
 0x231   :  { %639 = vsyncmov [#allocation3 + $0x3] }
 0x234   :  { %s640_s29 = vpop.sfrf %639 }
 0x235   :  { %p751_p7 = scmp.ne.s32.totalorder %s640_s29, 0 }
 0x237   :  { %644 = shalt.err (%p751_p7)  }
 0x238   :  { %646 = vsyncmov [#allocation3 + $0x4] }
 0x23b   :  { %s647_s8 = vpop.sfrf %646 }
 0x23c   :  { %p752_p8 = scmp.ne.s32.totalorder %s647_s8, 0 }
 0x23e   :  { %651 = shalt.err (%p752_p8)  }
 0x23f   :  { %653 = vsyncmov [#allocation3 + $0x5] }
 0x242   :  { %s654_s10 = vpop.sfrf %653 }
 0x243   :  { %p753_p9 = scmp.ne.s32.totalorder %s654_s10, 0 }
 0x245   :  { %658 = shalt.err (%p753_p9)  }
 0x246   :  { %660 = vsyncmov [#allocation3 + $0x6] }
 0x249   :  { %s661_s4 = vpop.sfrf %660 }
 0x24a   :  { %p754_p10 = scmp.ne.s32.totalorder %s661_s4, 0 }
 0x24c   :  { %665 = shalt.err (%p754_p10)  }
 0x24d   :  { %667 = vsyncmov [#allocation3 + $0x7] }
 0x250   :  { %s668_s0 = vpop.sfrf %667 }
 0x251   :  { %p755_p11 = scmp.ne.s32.totalorder %s668_s0, 0 }
 0x253   :  { %672 = shalt.err (%p755_p11)  }
 0x254   :  { %674 = vsyncmov [#allocation3 + $0x8] }
 0x257   :  { %s675_s11 = vpop.sfrf %674 }
 0x258   :  { %p756_p12 = scmp.ne.s32.totalorder %s675_s11, 0 }
 0x25a   :  { %679 = shalt.err (%p756_p12)  }
 0x25b   :  { %681 = vsyncmov [#allocation3 + $0x9] }
 0x25e   :  { %s682_s18 = vpop.sfrf %681 }
 0x25f   :  { %p757_p13 = scmp.ne.s32.totalorder %s682_s18, 0 }
 0x261   :  { %686 = shalt.err (%p757_p13)  }
 0x262   :  { %688 = vsyncmov [#allocation3 + $0xa] }
 0x265   :  { %s689_s12 = vpop.sfrf %688 }
 0x266   :  { %p758_p0 = scmp.ne.s32.totalorder %s689_s12, 0 }
 0x268   :  { %693 = shalt.err (%p758_p0)  }
 0x269   :  { %695 = vsyncmov [#allocation3 + $0xb] }
 0x26c   :  { %s696_s14 = vpop.sfrf %695 }
 0x26d   :  { %p759_p1 = scmp.ne.s32.totalorder %s696_s14, 0 }
 0x26f   :  { %700 = shalt.err (%p759_p1)  }

</bundles_post_ra>
